<compile_context>
chip_gen: v7x
topology: tpu7x:2x2x1
jax: 0.10.0
libtpu: 0.0.40
codegen_flags: <defaults>
</compile_context>

<pallas_src>
import jax
import jax.numpy as jnp
from jax.experimental import pallas as pl
from jax.experimental.pallas import tpu as pltpu

HIDDEN = 512     # fc1/fc2/fc3 width
N_ACT = 2        # action head width
K_PAD = 128      # padded input-feature width (lane-friendly)
OUT_PAD = 128    # padded action-head width (lane-dense output store)


def _round_up(x, m):
    return ((x + m - 1) // m) * m


def policy_net_kernel(s_ref, w1_ref, b1_ref, w2_ref, b2_ref,
                      w3_ref, b3_ref, wa_ref, ba_ref, o_ref):
    # fc1 + ReLU   (bf16 x bf16 -> f32 accumulate on the MXU)
    x = jnp.dot(s_ref[...], w1_ref[...], preferred_element_type=jnp.float32)
    x = jnp.maximum(x + b1_ref[...], 0.0)
    # fc2 + ReLU
    x = jnp.dot(x.astype(jnp.bfloat16), w2_ref[...],
                preferred_element_type=jnp.float32)
    x = jnp.maximum(x + b2_ref[...], 0.0)
    # fc3 + ReLU
    x = jnp.dot(x.astype(jnp.bfloat16), w3_ref[...],
                preferred_element_type=jnp.float32)
    x = jnp.maximum(x + b3_ref[...], 0.0)
    # action head + tanh (lane-dense 128-wide output; extra lanes are zeros)
    a = jnp.dot(x.astype(jnp.bfloat16), wa_ref[...],
                preferred_element_type=jnp.float32)
    o_ref[...] = jnp.tanh(a + ba_ref[...]).astype(o_ref.dtype)


def prepare_params(params):
    """One-time host-side prep: cast weights to bf16, pad w1's K to 128 and
    the action head to 128 output lanes. Biases stay f32 (added post-matmul)."""
    w1, b1, w2, b2, w3, b3, wa, ba = params
    f_in = w1.shape[0]
    assert f_in <= K_PAD and wa.shape[1] <= OUT_PAD
    w1p = jnp.zeros((K_PAD, HIDDEN), jnp.bfloat16)
    w1p = w1p.at[:f_in, :].set(w1.astype(jnp.bfloat16))
    wap = jnp.zeros((HIDDEN, OUT_PAD), jnp.bfloat16)
    wap = wap.at[:, :wa.shape[1]].set(wa.astype(jnp.bfloat16))
    bap = jnp.zeros((1, OUT_PAD), jnp.float32)
    bap = bap.at[:, :ba.shape[1]].set(ba.astype(jnp.float32))
    return (w1p, b1.astype(jnp.float32),
            w2.astype(jnp.bfloat16), b2.astype(jnp.float32),
            w3.astype(jnp.bfloat16), b3.astype(jnp.float32),
            wap, bap)


def policy_net_forward(s, prepared, *, batch_tile=256):
    """s: [B, 23] float32; returns [B, 2] float32."""
    w1p, b1, w2, b2, w3, b3, wap, bap = prepared
    B, f_in = s.shape
    assert f_in <= K_PAD

    # Tile selection: single no-pipeline step for small batches, MXU-aligned
    # tiles (multiple of 128) with host-side batch padding otherwise.
    if B <= batch_tile:
        tile = max(8, _round_up(B, 8))
    else:
        tile = batch_tile
    B_pad = _round_up(B, tile)
    grid = (B_pad // tile,)

    # Pad batch + feature dims and cast input to bf16 once on the host.
    s_pad = jnp.zeros((B_pad, K_PAD), jnp.bfloat16)
    s_pad = s_pad.at[:B, :f_in].set(s.astype(jnp.bfloat16))

    def const_spec(shape):
        # Grid-invariant parameter block: same (0,...,0) block every step,
        # so Pallas fetches it once and keeps it resident in VMEM.
        nd = len(shape)
        return pl.BlockSpec(shape, lambda i, _nd=nd: (0,) * _nd)

    out = pl.pallas_call(
        policy_net_kernel,
        out_shape=jax.ShapeDtypeStruct((B_pad, OUT_PAD), jnp.float32),
        grid_spec=pltpu.PrefetchScalarGridSpec(
            num_scalar_prefetch=0,
            grid=grid,
            in_specs=[
                pl.BlockSpec((tile, K_PAD), lambda i: (i, 0)),   # state tile
                const_spec(w1p.shape), const_spec(b1.shape),
                const_spec(w2.shape), const_spec(b2.shape),
                const_spec(w3.shape), const_spec(b3.shape),
                const_spec(wap.shape), const_spec(bap.shape),
            ],
            out_specs=pl.BlockSpec((tile, OUT_PAD), lambda i: (i, 0)),
        ),
        compiler_params=pltpu.CompilerParams(
            dimension_semantics=("parallel",)),
    )(s_pad, w1p, b1, w2, b2, w3, b3, wap, bap)

    return out[:B, :N_ACT]


def init_params(key):
    """Deterministic init matching nn.Linear shapes (weights stored as [in, out])."""
    dims = [(23, HIDDEN), (HIDDEN, HIDDEN), (HIDDEN, HIDDEN), (HIDDEN, N_ACT)]
    params = []
    for fan_in, fan_out in dims:
        kw, kb, key = jax.random.split(key, 3)
        bound = 1.0 / jnp.sqrt(jnp.float32(fan_in))
        w = jax.random.uniform(kw, (fan_in, fan_out), jnp.float32, -bound, bound)
        b = jax.random.uniform(kb, (1, fan_out), jnp.float32, -bound, bound)
        params.extend([w, b])
    return tuple(params)


def reference_forward_f32(s, params):
    """Pure f32 reference (original module semantics)."""
    w1, b1, w2, b2, w3, b3, wa, ba = params
    x = jnp.maximum(s @ w1 + b1, 0.0)
    x = jnp.maximum(x @ w2 + b2, 0.0)
    x = jnp.maximum(x @ w3 + b3, 0.0)
    return jnp.tanh(x @ wa + ba)


def reference_forward_bf16(s, prepared):
    """Reference that mirrors the kernel's bf16-weight / f32-accumulate math."""
    w1p, b1, w2, b2, w3, b3, wap, bap = prepared
    B, f_in = s.shape
    x = jnp.zeros((B, K_PAD), jnp.bfloat16).at[:, :f_in].set(s.astype(jnp.bfloat16))
    x = jnp.maximum(jnp.dot(x, w1p, preferred_element_type=jnp.float32) + b1, 0.0)
    x = jnp.maximum(jnp.dot(x.astype(jnp.bfloat16), w2,
                            preferred_element_type=jnp.float32) + b2, 0.0)
    x = jnp.maximum(jnp.dot(x.astype(jnp.bfloat16), w3,
                            preferred_element_type=jnp.float32) + b3, 0.0)
    a = jnp.dot(x.astype(jnp.bfloat16), wap,
                preferred_element_type=jnp.float32) + bap
    return jnp.tanh(a)[:, :N_ACT]


if __name__ == "__main__":
    key = jax.random.PRNGKey(0)
    k_in, k_params = jax.random.split(key)

    B = 8  # small batch, consistent with single-state policy inference
    s = jax.random.normal(k_in, (B, 23), jnp.float32)
    raw_params = init_params(k_params)
    prepared = prepare_params(raw_params)

    out = policy_net_forward(s, prepared)
    out = jax.block_until_ready(out)
    assert out.shape == (B, N_ACT)

    # Bit-for-bit-style check against a reference using identical bf16 math.
    ref_bf16 = reference_forward_bf16(s, prepared)
    assert jnp.allclose(out, ref_bf16, atol=1e-4, rtol=1e-4), "mismatch vs bf16 reference"

    # Sanity check against the original float32 module semantics.
    ref_f32 = reference_forward_f32(s, raw_params)
    assert jnp.allclose(out, ref_f32, atol=5e-2, rtol=5e-2), "mismatch vs f32 reference"

    print("KERNEL_OK")
</pallas_src>

<mosaic_0001>
module attributes {stable_mosaic.version = 11 : i64} {
  func.func @policy_net_kernel(%arg0: i32, %arg1: memref<8x128xbf16, #tpu.memory_space<vmem>>, %arg2: memref<128x512xbf16, #tpu.memory_space<vmem>>, %arg3: memref<1x512xf32, #tpu.memory_space<vmem>>, %arg4: memref<512x512xbf16, #tpu.memory_space<vmem>>, %arg5: memref<1x512xf32, #tpu.memory_space<vmem>>, %arg6: memref<512x512xbf16, #tpu.memory_space<vmem>>, %arg7: memref<1x512xf32, #tpu.memory_space<vmem>>, %arg8: memref<512x128xbf16, #tpu.memory_space<vmem>>, %arg9: memref<1x128xf32, #tpu.memory_space<vmem>>, %arg10: memref<8x128xf32, #tpu.memory_space<vmem>>) attributes {dimension_semantics = [#tpu.dimension_semantics<parallel>], iteration_bounds = array<i64: 1>, scalar_prefetch = 0 : i64, scratch_operands = 0 : i64, tpu.core_type = #tpu.core_type<tc>, window_params = [{transform_indices = @transform_0, window_bounds = array<i64: 8, 128>}, {pipeline_mode = #tpu.pipeline_mode<synchronous>, transform_indices = @transform_1, window_bounds = array<i64: 128, 512>}, {pipeline_mode = #tpu.pipeline_mode<synchronous>, transform_indices = @transform_2, window_bounds = array<i64: 1, 512>}, {pipeline_mode = #tpu.pipeline_mode<synchronous>, transform_indices = @transform_3, window_bounds = array<i64: 512, 512>}, {pipeline_mode = #tpu.pipeline_mode<synchronous>, transform_indices = @transform_4, window_bounds = array<i64: 1, 512>}, {pipeline_mode = #tpu.pipeline_mode<synchronous>, transform_indices = @transform_5, window_bounds = array<i64: 512, 512>}, {pipeline_mode = #tpu.pipeline_mode<synchronous>, transform_indices = @transform_6, window_bounds = array<i64: 1, 512>}, {pipeline_mode = #tpu.pipeline_mode<synchronous>, transform_indices = @transform_7, window_bounds = array<i64: 512, 128>}, {pipeline_mode = #tpu.pipeline_mode<synchronous>, transform_indices = @transform_8, window_bounds = array<i64: 1, 128>}, {transform_indices = @transform_9, window_bounds = array<i64: 8, 128>}]} {
    %c0 = arith.constant 0 : index
    %c0_0 = arith.constant 0 : index
    %0 = vector.load %arg1[%c0, %c0_0] : memref<8x128xbf16, #tpu.memory_space<vmem>>, vector<8x128xbf16>
    %c0_1 = arith.constant 0 : index
    %c0_2 = arith.constant 0 : index
    %1 = vector.load %arg2[%c0_1, %c0_2] : memref<128x512xbf16, #tpu.memory_space<vmem>>, vector<128x512xbf16>
    %cst = arith.constant dense<0.000000e+00> : vector<8x512xf32>
    %2 = tpu.matmul %0, %1, %cst {dimension_numbers = #tpu.dot_dimension_numbers<[1], [0], [0], [1], [0, 0, 1, 1], [], []>} : vector<8x128xbf16>, vector<128x512xbf16>, vector<8x512xf32> -> vector<8x512xf32>
    %c0_3 = arith.constant 0 : index
    %c0_4 = arith.constant 0 : index
    %3 = vector.load %arg3[%c0_3, %c0_4] : memref<1x512xf32, #tpu.memory_space<vmem>>, vector<1x512xf32>
    %4 = vector.broadcast %3 : vector<1x512xf32> to vector<8x512xf32>
    %5 = arith.addf %2, %4 : vector<8x512xf32>
    %cst_5 = arith.constant 0.000000e+00 : f32
    %6 = vector.broadcast %cst_5 : f32 to vector<8x512xf32>
    %7 = arith.maximumf %5, %6 : vector<8x512xf32>
    %8 = arith.truncf %7 : vector<8x512xf32> to vector<8x512xbf16>
    %c0_6 = arith.constant 0 : index
    %c0_7 = arith.constant 0 : index
    %9 = vector.load %arg4[%c0_6, %c0_7] : memref<512x512xbf16, #tpu.memory_space<vmem>>, vector<512x512xbf16>
    %cst_8 = arith.constant dense<0.000000e+00> : vector<8x512xf32>
    %10 = tpu.matmul %8, %9, %cst_8 {dimension_numbers = #tpu.dot_dimension_numbers<[1], [0], [0], [1], [0, 0, 1, 1], [], []>} : vector<8x512xbf16>, vector<512x512xbf16>, vector<8x512xf32> -> vector<8x512xf32>
    %c0_9 = arith.constant 0 : index
    %c0_10 = arith.constant 0 : index
    %11 = vector.load %arg5[%c0_9, %c0_10] : memref<1x512xf32, #tpu.memory_space<vmem>>, vector<1x512xf32>
    %12 = vector.broadcast %11 : vector<1x512xf32> to vector<8x512xf32>
    %13 = arith.addf %10, %12 : vector<8x512xf32>
    %cst_11 = arith.constant 0.000000e+00 : f32
    %14 = vector.broadcast %cst_11 : f32 to vector<8x512xf32>
    %15 = arith.maximumf %13, %14 : vector<8x512xf32>
    %16 = arith.truncf %15 : vector<8x512xf32> to vector<8x512xbf16>
    %c0_12 = arith.constant 0 : index
    %c0_13 = arith.constant 0 : index
    %17 = vector.load %arg6[%c0_12, %c0_13] : memref<512x512xbf16, #tpu.memory_space<vmem>>, vector<512x512xbf16>
    %cst_14 = arith.constant dense<0.000000e+00> : vector<8x512xf32>
    %18 = tpu.matmul %16, %17, %cst_14 {dimension_numbers = #tpu.dot_dimension_numbers<[1], [0], [0], [1], [0, 0, 1, 1], [], []>} : vector<8x512xbf16>, vector<512x512xbf16>, vector<8x512xf32> -> vector<8x512xf32>
    %c0_15 = arith.constant 0 : index
    %c0_16 = arith.constant 0 : index
    %19 = vector.load %arg7[%c0_15, %c0_16] : memref<1x512xf32, #tpu.memory_space<vmem>>, vector<1x512xf32>
    %20 = vector.broadcast %19 : vector<1x512xf32> to vector<8x512xf32>
    %21 = arith.addf %18, %20 : vector<8x512xf32>
    %cst_17 = arith.constant 0.000000e+00 : f32
    %22 = vector.broadcast %cst_17 : f32 to vector<8x512xf32>
    %23 = arith.maximumf %21, %22 : vector<8x512xf32>
    %24 = arith.truncf %23 : vector<8x512xf32> to vector<8x512xbf16>
    %c0_18 = arith.constant 0 : index
    %c0_19 = arith.constant 0 : index
    %25 = vector.load %arg8[%c0_18, %c0_19] : memref<512x128xbf16, #tpu.memory_space<vmem>>, vector<512x128xbf16>
    %cst_20 = arith.constant dense<0.000000e+00> : vector<8x128xf32>
    %26 = tpu.matmul %24, %25, %cst_20 {dimension_numbers = #tpu.dot_dimension_numbers<[1], [0], [0], [1], [0, 0, 1, 1], [], []>} : vector<8x512xbf16>, vector<512x128xbf16>, vector<8x128xf32> -> vector<8x128xf32>
    %c0_21 = arith.constant 0 : index
    %c0_22 = arith.constant 0 : index
    %27 = vector.load %arg9[%c0_21, %c0_22] : memref<1x128xf32, #tpu.memory_space<vmem>>, vector<1x128xf32>
    %28 = vector.broadcast %27 : vector<1x128xf32> to vector<8x128xf32>
    %29 = arith.addf %26, %28 : vector<8x128xf32>
    %30 = math.tanh %29 : vector<8x128xf32>
    %c0_23 = arith.constant 0 : index
    %c0_24 = arith.constant 0 : index
    %31 = vector.load %arg10[%c0_23, %c0_24] : memref<8x128xf32, #tpu.memory_space<vmem>>, vector<8x128xf32>
    tpu.vector_store %arg10[%c0_23, %c0_24], %30 {strides = array<i32>} : memref<8x128xf32, #tpu.memory_space<vmem>>, vector<8x128xf32>,
    return
  }
  func.func @transform_0(%arg0: i32) -> (i32, i32) {
    %c0_i32 = arith.constant 0 : i32
    %c0_i32_0 = arith.constant 0 : i32
    return %arg0, %c0_i32 : i32, i32
  }
  func.func @transform_1(%arg0: i32) -> (i32, i32) {
    %c0_i32 = arith.constant 0 : i32
    %c0_i32_0 = arith.constant 0 : i32
    %c0_i32_1 = arith.constant 0 : i32
    return %c0_i32, %c0_i32_0 : i32, i32
  }
  func.func @transform_2(%arg0: i32) -> (i32, i32) {
    %c0_i32 = arith.constant 0 : i32
    %c0_i32_0 = arith.constant 0 : i32
    %c0_i32_1 = arith.constant 0 : i32
    return %c0_i32, %c0_i32_0 : i32, i32
  }
  func.func @transform_3(%arg0: i32) -> (i32, i32) {
    %c0_i32 = arith.constant 0 : i32
    %c0_i32_0 = arith.constant 0 : i32
    %c0_i32_1 = arith.constant 0 : i32
    return %c0_i32, %c0_i32_0 : i32, i32
  }
  func.func @transform_4(%arg0: i32) -> (i32, i32) {
    %c0_i32 = arith.constant 0 : i32
    %c0_i32_0 = arith.constant 0 : i32
    %c0_i32_1 = arith.constant 0 : i32
    return %c0_i32, %c0_i32_0 : i32, i32
  }
  func.func @transform_5(%arg0: i32) -> (i32, i32) {
    %c0_i32 = arith.constant 0 : i32
    %c0_i32_0 = arith.constant 0 : i32
    %c0_i32_1 = arith.constant 0 : i32
    return %c0_i32, %c0_i32_0 : i32, i32
  }
  func.func @transform_6(%arg0: i32) -> (i32, i32) {
    %c0_i32 = arith.constant 0 : i32
    %c0_i32_0 = arith.constant 0 : i32
    %c0_i32_1 = arith.constant 0 : i32
    return %c0_i32, %c0_i32_0 : i32, i32
  }
  func.func @transform_7(%arg0: i32) -> (i32, i32) {
    %c0_i32 = arith.constant 0 : i32
    %c0_i32_0 = arith.constant 0 : i32
    %c0_i32_1 = arith.constant 0 : i32
    return %c0_i32, %c0_i32_0 : i32, i32
  }
  func.func @transform_8(%arg0: i32) -> (i32, i32) {
    %c0_i32 = arith.constant 0 : i32
    %c0_i32_0 = arith.constant 0 : i32
    %c0_i32_1 = arith.constant 0 : i32
    return %c0_i32, %c0_i32_0 : i32, i32
  }
  func.func @transform_9(%arg0: i32) -> (i32, i32) {
    %c0_i32 = arith.constant 0 : i32
    %c0_i32_0 = arith.constant 0 : i32
    return %arg0, %c0_i32 : i32, i32
  }
}

</mosaic_0001>

<bundles_post_ra>
// kernel: tpu_custom_call.1
= control target key start
LH: loop header
LB: loop body
LE: loop exit
PB: predicated region body
PF: predicated region fallthrough
CT: control target
= control target key end

     0   :  { %14 = vsyncpa [#allocation3], 0  ;;  %s3895_s0 = inlined_call_operand.hbm [shape: bf16[8,128], index: 0, kind: input, shape index: {}]   ;;  %s3896_s1 = inlined_call_operand.hbm [shape: bf16[128,512], index: 1, kind: input, shape index: {}]   ;;  %s3897_s2 = inlined_call_operand.vmem [shape: f32[1,512], index: 2, kind: input, shape index: {}]   ;;  %s3898_s3 = inlined_call_operand.hbm [shape: bf16[512,512], index: 3, kind: input, shape index: {}]   ;;  %s3899_s4 = inlined_call_operand.vmem [shape: f32[1,512], index: 4, kind: input, shape index: {}]   ;;  %s3900_s5 = inlined_call_operand.hbm [shape: bf16[512,512], index: 5, kind: input, shape index: {}]   ;;  %s3901_s6 = inlined_call_operand.vmem [shape: f32[1,512], index: 6, kind: input, shape index: {}]   ;;  %s3902_s7 = inlined_call_operand.hbm [shape: bf16[512,128], index: 7, kind: input, shape index: {}]   ;;  %s3903_s8 = inlined_call_operand.vmem [shape: f32[1,128], index: 8, kind: input, shape index: {}]   ;;  %s3904_s9 = inlined_call_operand.hbm [shape: f32[8,128], index: 9, kind: output, shape index: {}]  }
   0x1   :  { %15 = vsyncpa [#allocation6], 0 }
   0x2   :  { %16 = vsyncpa [#allocation9], 0 }
   0x3   :  { %17 = vsyncpa [#allocation4], 0  ;;  %s3697_s30 = smov [#allocation5]   ;;  %s3557_s13 = scalar_lea.hbm %s3896_s1, 4096 }
   0x4   :  { %s33_s10 = sshll.u32 %s3697_s30, 4  ;;  %p3558_p0 = scmp.ne.s32.totalorder %s3896_s1, %s3557_s13  ;;  %s34_s10 = int_to_ptr.vmem [resolvable:$true] %s33_s10 }
   0x5   :  { %p3561_p1 = scmp.lt.u32.totalorder %s3557_s13, %s3896_s1 }
   0x7   :  { %p3563_p2 = pnand %p3561_p1, %p3558_p0 }
   0x9   :  { %3566 = shalt.err (!%p3563_p2)
}
   0xa   :  { %s3567_s18 = scalar_lea.vmem %s34_s10, 4096  ;;  %p3572_p4 = scmp.lt.s32.totalorder %s34_s10, %s34_s10 }
   0xb   :  { %p3568_p3 = scmp.ne.s32.totalorder %s34_s10, %s3567_s18  ;;  %p3573_p5 = scmp.lt.s32.totalorder %s3567_s18, %s3567_s18 }
   0xd   :  { %p3574_p6 = por %p3573_p5, %p3572_p4 }
   0xf   :  { %p3575_p7 = pnand %p3574_p6, %p3568_p3 }
  0x11   :  { %3578 = shalt.err (!%p3575_p7)
}
  0x12   :  { %s3698_s19 = smov 256   ;;  %s3699_s20 = smov 16  }
  0x13   :  { %39 = dma.hbm_to_vmem [thread:$0]  %s3896_s1, 4096, %s34_s10, [#allocation6], %s3698_s19, %s3698_s19, %s3699_s20  }
  0x14   :  { %s3700_s23 = smov [#allocation8]   ;;  %s3701_s25 = smov [#allocation2]  }
  0x15   :  { %s61_s24 = sshll.u32 %s3700_s23, 4  ;;  %s24_s26 = sshll.u32 %s3701_s25, 4  ;;  %s62_s24 = int_to_ptr.vmem [resolvable:$true] %s61_s24  ;;  %s25_s26 = int_to_ptr.vmem [resolvable:$true] %s24_s26 }
  0x16   :  { %s3579_s29 = scalar_lea.hbm %s3900_s5, 16384 }
  0x17   :  { %p3580_p8 = scmp.ne.s32.totalorder %s3900_s5, %s3579_s29  ;;  %p3583_p9 = scmp.lt.u32.totalorder %s3579_s29, %s3900_s5 }
  0x19   :  { %p3585_p10 = pnand %p3583_p9, %p3580_p8 }
  0x1b   :  { %3588 = shalt.err (!%p3585_p10)
}
  0x1c   :  { %s3589_s1 = scalar_lea.vmem %s62_s24, 16384  ;;  %p3594_p12 = scmp.lt.s32.totalorder %s62_s24, %s62_s24 }
  0x1d   :  { %p3590_p11 = scmp.ne.s32.totalorder %s62_s24, %s3589_s1  ;;  %p3595_p13 = scmp.lt.s32.totalorder %s3589_s1, %s3589_s1 }
  0x1f   :  { %p3596_p0 = por %p3595_p13, %p3594_p12 }
  0x21   :  { %p3597_p1 = pnand %p3596_p0, %p3590_p11 }
  0x23   :  { %3600 = shalt.err (!%p3597_p1)
}
  0x24   :  { %67 = dma.hbm_to_vmem [thread:$0]  %s3900_s5, 16384, %s62_s24, [#allocation9], %s3698_s19, %s3698_s19, %s3699_s20  }
  0x25   :  { %s3601_s17 = scalar_lea.hbm %s3895_s0, 64 }
  0x26   :  { %p3602_p2 = scmp.ne.s32.totalorder %s3895_s0, %s3601_s17  ;;  %p3605_p3 = scmp.lt.u32.totalorder %s3601_s17, %s3895_s0 }
  0x28   :  { %p3607_p4 = pnand %p3605_p3, %p3602_p2 }
  0x2a   :  { %3610 = shalt.err (!%p3607_p4)
}
  0x2b   :  { %s3611_s25 = scalar_lea.vmem %s25_s26, 64  ;;  %p3616_p6 = scmp.lt.s32.totalorder %s25_s26, %s25_s26 }
  0x2c   :  { %p3612_p5 = scmp.ne.s32.totalorder %s25_s26, %s3611_s25  ;;  %p3617_p7 = scmp.lt.s32.totalorder %s3611_s25, %s3611_s25 }
  0x2e   :  { %p3618_p8 = por %p3617_p7, %p3616_p6 }
  0x30   :  { %p3619_p9 = pnand %p3618_p8, %p3612_p5 }
  0x32   :  { %3622 = shalt.err (!%p3619_p9)
}
  0x33   :  { %27 = dma.hbm_to_vmem [thread:$0]  %s3895_s0, 64, %s25_s26, [#allocation3]  }
  0x34   :  { %s3702_s27 = smov [#allocation7]   ;;  %s3703_s29 = smov [#allocation10]  }
  0x35   :  { %s47_s28 = sshll.u32 %s3702_s27, 4  ;;  %s75_s30 = sshll.u32 %s3703_s29, 4  ;;  %s48_s28 = int_to_ptr.vmem [resolvable:$true] %s47_s28  ;;  %s76_s30 = int_to_ptr.vmem [resolvable:$true] %s75_s30 }
  0x36   :  { %s3623_s13 = scalar_lea.hbm %s3898_s3, 16384 }
  0x37   :  { %p3624_p10 = scmp.ne.s32.totalorder %s3898_s3, %s3623_s13  ;;  %p3627_p11 = scmp.lt.u32.totalorder %s3623_s13, %s3898_s3 }
  0x39   :  { %p3629_p12 = pnand %p3627_p11, %p3624_p10 }
  0x3b   :  { %3632 = shalt.err (!%p3629_p12)
}
  0x3c   :  { %s3633_s0 = scalar_lea.vmem %s48_s28, 16384  ;;  %p3638_p0 = scmp.lt.s32.totalorder %s48_s28, %s48_s28 }
  0x3d   :  { %p3634_p13 = scmp.ne.s32.totalorder %s48_s28, %s3633_s0  ;;  %p3639_p1 = scmp.lt.s32.totalorder %s3633_s0, %s3633_s0 }
  0x3f   :  { %p3640_p2 = por %p3639_p1, %p3638_p0 }
  0x41   :  { %p3641_p3 = pnand %p3640_p2, %p3634_p13 }
  0x43   :  { %3644 = shalt.err (!%p3641_p3)
}
  0x44   :  { %53 = dma.hbm_to_vmem [thread:$0]  %s3898_s3, 16384, %s48_s28, [#allocation6], %s3698_s19, %s3698_s19, %s3699_s20  }
  0x45   :  { %s3645_s21 = scalar_lea.hbm %s3902_s7, 4096 }
  0x46   :  { %p3646_p4 = scmp.ne.s32.totalorder %s3902_s7, %s3645_s21  ;;  %p3649_p5 = scmp.lt.u32.totalorder %s3645_s21, %s3902_s7 }
  0x48   :  { %p3651_p6 = pnand %p3649_p5, %p3646_p4 }
  0x4a   :  { %3654 = shalt.err (!%p3651_p6)
}
  0x4b   :  { %s3655_s24 = scalar_lea.vmem %s76_s30, 4096  ;;  %p3660_p8 = scmp.lt.s32.totalorder %s76_s30, %s76_s30 }
  0x4c   :  { %p3656_p7 = scmp.ne.s32.totalorder %s76_s30, %s3655_s24  ;;  %p3661_p9 = scmp.lt.s32.totalorder %s3655_s24, %s3655_s24 }
  0x4e   :  { %p3662_p10 = por %p3661_p9, %p3660_p8 }
  0x50   :  { %p3663_p11 = pnand %p3662_p10, %p3656_p7 }
  0x52   :  { %3666 = shalt.err (!%p3663_p11)
}
  0x53   :  { %s3704_s3 = smov 64   ;;  %s3705_s19 = smov 4  }
  0x54   :  { %81 = dma.hbm_to_vmem [thread:$0]  %s3902_s7, 4096, %s76_s30, [#allocation9], %s3704_s3, %s3704_s3, %s3705_s19  }
  0x55   :  { %3689 = dma.done.wait [#allocation3], 64  }
  0x56   :  { %3690 = vsyncadd [#allocation3], 4294967232 }
  0x57   :  { %3691 = dma.done.wait [#allocation6], 20480  }
  0x58   :  { %3692 = vsyncadd [#allocation6], 4294946816 }
  0x59   :  { %3693 = dma.done.wait [#allocation9], 20480  }
  0x5a   :  { %3694 = vsyncadd [#allocation9], 4294946816  ;;  %v3706_v0 = vmov 0   ;;  %v3091_v1 = vld [vmem:[#allocation5 + $0x4] ss:$16 sps:$4 sm:$0xff]   ;;  %s3707_s12 = smov [#allocation11]  }
  0x5b   :  { %347 = vmatprep.mubr.bf16.mxu0 %v3706_v0  ;;  %388 = vmatprep.mubr.bf16.mxu1 %v3706_v0  ;;  %v3093_v2 = vld [vmem:[#allocation5] ss:$16 sps:$4 sm:$0xff]   ;;  %v3094_v3 = vld [vmem:[#allocation5 + $0x24] ss:$16 sps:$4 sm:$0xff]   ;;  %v3115_v10 = vld [vmem:[#allocation5 + $0xc] ss:$16 sps:$4 sm:$0xff]  }
  0x5c   :  { %315 = vmatprep.subr.bf16.mxu0 %v3091_v1  ;;  %v3096_v4 = vld [vmem:[#allocation5 + $0x20] ss:$16 sps:$4 sm:$0xff]   ;;  %v3097_v5 = vld [vmem:[#allocation5 + $0x44] ss:$16 sps:$4 sm:$0xff]   ;;  %v3117_v11 = vld [vmem:[#allocation5 + $0x8] ss:$16 sps:$4 sm:$0xff]   ;;  %356 = vmatprep.subr.bf16.mxu1 %v3115_v10 }
  0x5d   :  { %316 = vmatpush1.bf16.msra.mxu0 %v3093_v2  ;;  %v3099_v6 = vld [vmem:[#allocation5 + $0x40] ss:$16 sps:$4 sm:$0xff]   ;;  %v3100_v7 = vld [vmem:[#allocation5 + $0x64] ss:$16 sps:$4 sm:$0xff]   ;;  %v3118_v12 = vld [vmem:[#allocation5 + $0x2c] ss:$16 sps:$4 sm:$0xff]   ;;  %357 = vmatpush1.bf16.msra.mxu1 %v3117_v11 }
  0x5e   :  { %317 = vmatprep.subr.bf16.mxu0 %v3094_v3  ;;  %v3102_v8 = vld [vmem:[#allocation5 + $0x60] ss:$16 sps:$4 sm:$0xff]   ;;  %v3103_v9 = vld [vmem:[#allocation5 + $0x84] ss:$16 sps:$4 sm:$0xff]   ;;  %v3120_v14 = vld [vmem:[#allocation5 + $0x28] ss:$16 sps:$4 sm:$0xff]   ;;  %358 = vmatprep.subr.bf16.mxu1 %v3118_v12 }
  0x5f   :  { %v3105_v13 = vld [vmem:[#allocation5 + $0x80] ss:$16 sps:$4 sm:$0xff]   ;;  %v3121_v15 = vld [vmem:[#allocation5 + $0x4c] ss:$16 sps:$4 sm:$0xff]   ;;  %v3106_v16 = vld [vmem:[#allocation5 + $0xa4] ss:$16 sps:$4 sm:$0xff]  }
  0x60   :  { %v3108_v17 = vld [vmem:[#allocation5 + $0xa0] ss:$16 sps:$4 sm:$0xff]   ;;  %v3123_v18 = vld [vmem:[#allocation5 + $0x48] ss:$16 sps:$4 sm:$0xff]   ;;  %v3124_v19 = vld [vmem:[#allocation5 + $0x6c] ss:$16 sps:$4 sm:$0xff]  }
  0x61   :  { %318 = vmatpush1.bf16.msra.mxu0 %v3096_v4  ;;  %359 = vmatpush1.bf16.msra.mxu1 %v3120_v14  ;;  %v3109_v20 = vld [vmem:[#allocation5 + $0xc4] ss:$16 sps:$4 sm:$0xff]   ;;  %v3111_v21 = vld [vmem:[#allocation5 + $0xc0] ss:$16 sps:$4 sm:$0xff]   ;;  %v3126_v22 = vld [vmem:[#allocation5 + $0x68] ss:$16 sps:$4 sm:$0xff]  }
  0x62   :  { %319 = vmatprep.subr.bf16.mxu0 %v3097_v5  ;;  %360 = vmatprep.subr.bf16.mxu1 %v3121_v15  ;;  %v3127_v23 = vld [vmem:[#allocation5 + $0x8c] ss:$16 sps:$4 sm:$0xff]   ;;  %v3112_v24 = vld [vmem:[#allocation5 + $0xe4] ss:$16 sps:$4 sm:$0xff]   ;;  %v3114_v25 = vld [vmem:[#allocation5 + $0xe0] ss:$16 sps:$4 sm:$0xff]  }
  0x63   :  { %v3129_v26 = vld [vmem:[#allocation5 + $0x88] ss:$16 sps:$4 sm:$0xff]   ;;  %v3130_v27 = vld [vmem:[#allocation5 + $0xac] ss:$16 sps:$4 sm:$0xff]   ;;  %v3141_v28 = vld [vmem:[#allocation7 + $0x4] ss:$16 sps:$4 sm:$0xff]  }
  0x64   :  { %v100_v29 = vld [vmem:[#allocation2] sm:$0xf]  ;;  %v3132_v30 = vld [vmem:[#allocation5 + $0xa8] ss:$16 sps:$4 sm:$0xff]   ;;  %v3139_v32 = vld [vmem:[#allocation7] ss:$16 sps:$4 sm:$0xff]  }
  0x65   :  { %320 = vmatpush1.bf16.msra.mxu0 %v3099_v6  ;;  %361 = vmatpush1.bf16.msra.mxu1 %v3123_v18  ;;  %v3133_v31 = vld [vmem:[#allocation5 + $0xcc] ss:$16 sps:$4 sm:$0xff]   ;;  %v3147_v33 = vld [vmem:[#allocation7 + $0x24] ss:$16 sps:$4 sm:$0xff]   ;;  %v3135_v34 = vld [vmem:[#allocation5 + $0xc8] ss:$16 sps:$4 sm:$0xff]  }
  0x66   :  { %321 = vmatprep.subr.bf16.mxu0 %v3100_v7  ;;  %362 = vmatprep.subr.bf16.mxu1 %v3124_v19  ;;  %v3136_v35 = vld [vmem:[#allocation5 + $0xec] ss:$16 sps:$4 sm:$0xff]   ;;  %v3145_v36 = vld [vmem:[#allocation7 + $0x20] ss:$16 sps:$4 sm:$0xff]   ;;  %v3153_v37 = vld [vmem:[#allocation7 + $0x44] ss:$16 sps:$4 sm:$0xff]  }
  0x67   :  { %v3138_v38 = vld [vmem:[#allocation5 + $0xe8] ss:$16 sps:$4 sm:$0xff]   ;;  %v3144_v39 = vld [vmem:[#allocation7 + $0xc] ss:$16 sps:$4 sm:$0xff]   ;;  %v3151_v40 = vld [vmem:[#allocation7 + $0x40] ss:$16 sps:$4 sm:$0xff]  }
  0x68   :  { %v3159_v41 = vld [vmem:[#allocation7 + $0x64] ss:$16 sps:$4 sm:$0xff]   ;;  %v3142_v42 = vld [vmem:[#allocation7 + $0x8] ss:$16 sps:$4 sm:$0xff]   ;;  %v3150_v43 = vld [vmem:[#allocation7 + $0x2c] ss:$16 sps:$4 sm:$0xff]  }
  0x69   :  { %322 = vmatpush1.bf16.msra.mxu0 %v3102_v8  ;;  %363 = vmatpush1.bf16.msra.mxu1 %v3126_v22  ;;  %v3157_v44 = vld [vmem:[#allocation7 + $0x60] ss:$16 sps:$4 sm:$0xff]   ;;  %v3165_v45 = vld [vmem:[#allocation7 + $0x84] ss:$16 sps:$4 sm:$0xff]   ;;  %v3148_v46 = vld [vmem:[#allocation7 + $0x28] ss:$16 sps:$4 sm:$0xff]  }
  0x6a   :  { %323 = vmatprep.subr.bf16.mxu0 %v3103_v9  ;;  %364 = vmatprep.subr.bf16.mxu1 %v3127_v23  ;;  %v3156_v47 = vld [vmem:[#allocation7 + $0x4c] ss:$16 sps:$4 sm:$0xff]   ;;  %v3163_v48 = vld [vmem:[#allocation7 + $0x80] ss:$16 sps:$4 sm:$0xff]   ;;  %v3171_v49 = vld [vmem:[#allocation7 + $0xa4] ss:$16 sps:$4 sm:$0xff]  }
  0x6b   :  { %v3154_v50 = vld [vmem:[#allocation7 + $0x48] ss:$16 sps:$4 sm:$0xff]   ;;  %v3162_v51 = vld [vmem:[#allocation7 + $0x6c] ss:$16 sps:$4 sm:$0xff]   ;;  %v3169_v52 = vld [vmem:[#allocation7 + $0xa0] ss:$16 sps:$4 sm:$0xff]  }
  0x6c   :  { %v3177_v53 = vld [vmem:[#allocation7 + $0xc4] ss:$16 sps:$4 sm:$0xff]   ;;  %v3160_v54 = vld [vmem:[#allocation7 + $0x68] ss:$16 sps:$4 sm:$0xff]   ;;  %v3168_v55 = vld [vmem:[#allocation7 + $0x8c] ss:$16 sps:$4 sm:$0xff]  }
  0x6d   :  { %324 = vmatpush1.bf16.msra.mxu0 %v3105_v13  ;;  %365 = vmatpush1.bf16.msra.mxu1 %v3129_v26  ;;  %v3175_v56 = vld [vmem:[#allocation7 + $0xc0] ss:$16 sps:$4 sm:$0xff]   ;;  %v3183_v57 = vld [vmem:[#allocation7 + $0xe4] ss:$16 sps:$4 sm:$0xff]   ;;  %v3166_v58 = vld [vmem:[#allocation7 + $0x88] ss:$16 sps:$4 sm:$0xff]  }
  0x6e   :  { %325 = vmatprep.subr.bf16.mxu0 %v3106_v16  ;;  %366 = vmatprep.subr.bf16.mxu1 %v3130_v27  ;;  %v3174_v59 = vld [vmem:[#allocation7 + $0xac] ss:$16 sps:$4 sm:$0xff]   ;;  %v3181_v60 = vld [vmem:[#allocation7 + $0xe0] ss:$16 sps:$4 sm:$0xff]   ;;  %v3189_v61 = vld [vmem:[#allocation7 + $0x104] ss:$16 sps:$4 sm:$0xff]  }
  0x6f   :  { %v3172_v62 = vld [vmem:[#allocation7 + $0xa8] ss:$16 sps:$4 sm:$0xff]   ;;  %v3180_v63 = vld [vmem:[#allocation7 + $0xcc] ss:$16 sps:$4 sm:$0xff]   ;;  %v3187_v0 = vld [vmem:[#allocation7 + $0x100] ss:$16 sps:$4 sm:$0xff]  }
  0x70   :  { %v3195_v1 = vld [vmem:[#allocation7 + $0x124] ss:$16 sps:$4 sm:$0xff]   ;;  %v3178_v2 = vld [vmem:[#allocation7 + $0xc8] ss:$16 sps:$4 sm:$0xff]   ;;  %v3186_v3 = vld [vmem:[#allocation7 + $0xec] ss:$16 sps:$4 sm:$0xff]  }
  0x71   :  { %326 = vmatpush1.bf16.msra.mxu0 %v3108_v17  ;;  %367 = vmatpush1.bf16.msra.mxu1 %v3132_v30  ;;  %v3193_v4 = vld [vmem:[#allocation7 + $0x120] ss:$16 sps:$4 sm:$0xff]   ;;  %v3201_v5 = vld [vmem:[#allocation7 + $0x144] ss:$16 sps:$4 sm:$0xff]   ;;  %v3184_v6 = vld [vmem:[#allocation7 + $0xe8] ss:$16 sps:$4 sm:$0xff]  }
  0x72   :  { %327 = vmatprep.subr.bf16.mxu0 %v3109_v20  ;;  %368 = vmatprep.subr.bf16.mxu1 %v3133_v31  ;;  %v3192_v7 = vld [vmem:[#allocation7 + $0x10c] ss:$16 sps:$4 sm:$0xff]   ;;  %v3199_v8 = vld [vmem:[#allocation7 + $0x140] ss:$16 sps:$4 sm:$0xff]   ;;  %v3207_v9 = vld [vmem:[#allocation7 + $0x164] ss:$16 sps:$4 sm:$0xff]  }
  0x73   :  { %v3190_v10 = vld [vmem:[#allocation7 + $0x108] ss:$16 sps:$4 sm:$0xff]   ;;  %v3198_v11 = vld [vmem:[#allocation7 + $0x12c] ss:$16 sps:$4 sm:$0xff]   ;;  %v3205_v12 = vld [vmem:[#allocation7 + $0x160] ss:$16 sps:$4 sm:$0xff]  }
  0x74   :  { %v3213_v13 = vld [vmem:[#allocation7 + $0x184] ss:$16 sps:$4 sm:$0xff]   ;;  %v3196_v14 = vld [vmem:[#allocation7 + $0x128] ss:$16 sps:$4 sm:$0xff]   ;;  %v3204_v15 = vld [vmem:[#allocation7 + $0x14c] ss:$16 sps:$4 sm:$0xff]  }
  0x75   :  { %328 = vmatpush1.bf16.msra.mxu0 %v3111_v21  ;;  %369 = vmatpush1.bf16.msra.mxu1 %v3135_v34  ;;  %v3211_v16 = vld [vmem:[#allocation7 + $0x180] ss:$16 sps:$4 sm:$0xff]   ;;  %v3219_v17 = vld [vmem:[#allocation7 + $0x1a4] ss:$16 sps:$4 sm:$0xff]   ;;  %v3202_v18 = vld [vmem:[#allocation7 + $0x148] ss:$16 sps:$4 sm:$0xff]  }
  0x76   :  { %329 = vmatprep.subr.bf16.mxu0 %v3112_v24  ;;  %370 = vmatprep.subr.bf16.mxu1 %v3136_v35  ;;  %v3210_v19 = vld [vmem:[#allocation7 + $0x16c] ss:$16 sps:$4 sm:$0xff]   ;;  %v3217_v20 = vld [vmem:[#allocation7 + $0x1a0] ss:$16 sps:$4 sm:$0xff]   ;;  %v3208_v21 = vld [vmem:[#allocation7 + $0x168] ss:$16 sps:$4 sm:$0xff]  }
  0x77   :  { %v3216_v22 = vld [vmem:[#allocation7 + $0x18c] ss:$16 sps:$4 sm:$0xff]   ;;  %v3214_v23 = vld [vmem:[#allocation7 + $0x188] ss:$16 sps:$4 sm:$0xff]   ;;  %v3225_v26 = vld [vmem:[#allocation7 + $0x1c4] ss:$16 sps:$4 sm:$0xff]  }
  0x78   :  { %v3222_v24 = vld [vmem:[#allocation7 + $0x1ac] ss:$16 sps:$4 sm:$0xff]   ;;  %v3231_v30 = vld [vmem:[#allocation7 + $0x1e4] ss:$16 sps:$4 sm:$0xff]   ;;  %s2680_s13 = sshll.u32 %s3707_s12, 4  ;;  %s2681_s13 = int_to_ptr.vmem [resolvable:$true] %s2680_s13 }
  0x79   :  { %330 = vmatpush1.bf16.msra.mxu0 %v3114_v25  ;;  %371 = vmatpush1.bf16.msra.mxu1 %v3138_v38  ;;  %v3220_v25 = vld [vmem:[#allocation7 + $0x1a8] ss:$16 sps:$4 sm:$0xff]   ;;  %v3228_v27 = vld [vmem:[#allocation7 + $0x1cc] ss:$16 sps:$4 sm:$0xff]   ;;  %v3237_v34 = vld [vmem:[#allocation7 + $0x204] ss:$16 sps:$4 sm:$0xff]   ;;  %p3672_p13 = scmp.lt.s32.totalorder %s2681_s13, %s2681_s13 }
  0x7a   :  { %1195 = vmatprep.subr.bf16.mxu0 %v3141_v28  ;;  %1277 = vmatprep.subr.bf16.mxu1 %v3144_v39  ;;  %v3223_v28 = vld [vmem:[#allocation7 + $0x1c0] ss:$16 sps:$4 sm:$0xff]   ;;  %v3234_v31 = vld [vmem:[#allocation7 + $0x1ec] ss:$16 sps:$4 sm:$0xff]   ;;  %s3667_s1 = scalar_lea.vmem %s2681_s13, 128 }
  0x7b   :  { %v3240_v35 = vld [vmem:[#allocation7 + $0x20c] ss:$16 sps:$4 sm:$0xff]   ;;  %p3668_p12 = scmp.ne.s32.totalorder %s2681_s13, %s3667_s1  ;;  %p3673_p0 = scmp.lt.s32.totalorder %s3667_s1, %s3667_s1 }
  0x7c   :  { %348 = vmatmul.mubr.bf16.vlgmr.msra.gmra.mrb[0].mxu0 %v100_v29  ;;  %389 = vmatmul.mubr.bf16.vlgmr.msra.gmra.mrb[0].mxu1 %v100_v29  ;;  %v3226_v29 = vld [vmem:[#allocation7 + $0x1c8] ss:$16 sps:$4 sm:$0xff]   ;;  %v3835_v39 = vld [vmem:[%s3897_s2] sm:$0xf] }
  0x7d   :  { %1196 = vmatpush1.bf16.msra.mxu0 %v3139_v32  ;;  %1278 = vmatpush1.bf16.msra.mxu1 %v3142_v42  ;;  %v3229_v32 = vld [vmem:[#allocation7 + $0x1e0] ss:$16 sps:$4 sm:$0xff]   ;;  %p3674_p1 = por %p3673_p0, %p3672_p13 }
  0x7e   :  { %1197 = vmatprep.subr.bf16.mxu0 %v3147_v33  ;;  %1279 = vmatprep.subr.bf16.mxu1 %v3150_v43  ;;  %v3232_v33 = vld [vmem:[#allocation7 + $0x1e8] ss:$16 sps:$4 sm:$0xff]  }
  0x7f   :  { %p3675_p2 = pnand %p3674_p1, %p3668_p12 }
  0x81   :  { %1198 = vmatpush1.bf16.msra.mxu0 %v3145_v36  ;;  %1280 = vmatpush1.bf16.msra.mxu1 %v3148_v46  ;;  %v135_v36 = vlaneseq }
  0x82   :  { %1199 = vmatprep.subr.bf16.mxu0 %v3153_v37  ;;  %1281 = vmatprep.subr.bf16.mxu1 %v3156_v47 }
  0x83   :  { %v3827_v37 = vshrl.u32 %v135_v36, 7  ;;  %v3297_v36 = vld [vmem:[#allocation7 + $0x344] ss:$16 sps:$4 sm:$0xff]  }
  0x85   :  { %1200 = vmatpush1.bf16.msra.mxu0 %v3151_v40  ;;  %1282 = vmatpush1.bf16.msra.mxu1 %v3154_v50  ;;  %v3830_v38 = vsub.s32 0, %v3827_v37  ;;  %v3838_v40 = vsub.s32 1, %v3827_v37 }
  0x86   :  { %1201 = vmatprep.subr.bf16.mxu0 %v3159_v41  ;;  %1283 = vmatprep.subr.bf16.mxu1 %v3162_v51  ;;  %v3845_v51 = vsub.s32 3, %v3827_v37 }
  0x87   :  { %v138_v41 = vrot.slane %v3835_v39, %v3830_v38  ;;  %v142_v42 = vrot.slane %v3835_v39, %v3838_v40 }
  0x89   :  { %1202 = vmatpush1.bf16.msra.mxu0 %v3157_v44  ;;  %1284 = vmatpush1.bf16.msra.mxu1 %v3160_v54  ;;  %v3238_v54 = vld [vmem:[#allocation7 + $0x208] ss:$16 sps:$4 sm:$0xff]  }
  0x8a   :  { %1203 = vmatprep.subr.bf16.mxu0 %v3165_v45  ;;  %1285 = vmatprep.subr.bf16.mxu1 %v3168_v55 }
  0x8d   :  { %1204 = vmatpush1.bf16.msra.mxu0 %v3163_v48  ;;  %1286 = vmatpush1.bf16.msra.mxu1 %v3166_v58  ;;  %v150_v58 = vrot.slane %v3835_v39, %v3845_v51 }
  0x8e   :  { %1205 = vmatprep.subr.bf16.mxu0 %v3171_v49  ;;  %1287 = vmatprep.subr.bf16.mxu1 %v3174_v59  ;;  %v3241_v59 = vld [vmem:[#allocation7 + $0x220] ss:$16 sps:$4 sm:$0xff]  }
  0x91   :  { %1206 = vmatpush1.bf16.msra.mxu0 %v3169_v52  ;;  %1288 = vmatpush1.bf16.msra.mxu1 %v3172_v62  ;;  %v3252_v62 = vld [vmem:[#allocation7 + $0x24c] ss:$16 sps:$4 sm:$0xff]  }
  0x92   :  { %1207 = vmatprep.subr.bf16.mxu0 %v3177_v53  ;;  %1289 = vmatprep.subr.bf16.mxu1 %v3180_v63  ;;  %v3235_v53 = vld [vmem:[#allocation7 + $0x200] ss:$16 sps:$4 sm:$0xff]  }
  0x95   :  { %1208 = vmatpush1.bf16.msra.mxu0 %v3175_v56  ;;  %1290 = vmatpush1.bf16.msra.mxu1 %v3178_v2  ;;  %v3243_v56 = vld [vmem:[#allocation7 + $0x224] ss:$16 sps:$4 sm:$0xff]  }
  0x96   :  { %1209 = vmatprep.subr.bf16.mxu0 %v3183_v57  ;;  %1291 = vmatprep.subr.bf16.mxu1 %v3186_v3  ;;  %v3246_v57 = vld [vmem:[#allocation7 + $0x22c] ss:$16 sps:$4 sm:$0xff]   ;;  %v3247_v3 = vld [vmem:[#allocation7 + $0x240] ss:$16 sps:$4 sm:$0xff]  }
  0x99   :  { %1210 = vmatpush1.bf16.msra.mxu0 %v3181_v60  ;;  %1292 = vmatpush1.bf16.msra.mxu1 %v3184_v6  ;;  %v3244_v60 = vld [vmem:[#allocation7 + $0x228] ss:$16 sps:$4 sm:$0xff]   ;;  %v3255_v6 = vld [vmem:[#allocation7 + $0x264] ss:$16 sps:$4 sm:$0xff]  }
  0x9a   :  { %1211 = vmatprep.subr.bf16.mxu0 %v3189_v61  ;;  %1293 = vmatprep.subr.bf16.mxu1 %v3192_v7  ;;  %v3249_v61 = vld [vmem:[#allocation7 + $0x244] ss:$16 sps:$4 sm:$0xff]   ;;  %v3258_v7 = vld [vmem:[#allocation7 + $0x26c] ss:$16 sps:$4 sm:$0xff]  }
  0x9d   :  { %1212 = vmatpush1.bf16.msra.mxu0 %v3187_v0  ;;  %1294 = vmatpush1.bf16.msra.mxu1 %v3190_v10  ;;  %v3253_v10 = vld [vmem:[#allocation7 + $0x260] ss:$16 sps:$4 sm:$0xff]  }
  0x9e   :  { %1213 = vmatprep.subr.bf16.mxu0 %v3195_v1  ;;  %1295 = vmatprep.subr.bf16.mxu1 %v3198_v11  ;;  %v3256_v11 = vld [vmem:[#allocation7 + $0x268] ss:$16 sps:$4 sm:$0xff]  }
  0xa1   :  { %1214 = vmatpush1.bf16.msra.mxu0 %v3193_v4  ;;  %1296 = vmatpush1.bf16.msra.mxu1 %v3196_v14  ;;  %v3250_v4 = vld [vmem:[#allocation7 + $0x248] ss:$16 sps:$4 sm:$0xff]   ;;  %v3259_v14 = vld [vmem:[#allocation7 + $0x280] ss:$16 sps:$4 sm:$0xff]  }
  0xa2   :  { %1215 = vmatprep.subr.bf16.mxu0 %v3201_v5  ;;  %1297 = vmatprep.subr.bf16.mxu1 %v3204_v15  ;;  %v3262_v15 = vld [vmem:[#allocation7 + $0x288] ss:$16 sps:$4 sm:$0xff]  }
  0xa5   :  { %1216 = vmatpush1.bf16.msra.mxu0 %v3199_v8  ;;  %1298 = vmatpush1.bf16.msra.mxu1 %v3202_v18  ;;  %v3265_v18 = vld [vmem:[#allocation7 + $0x2a0] ss:$16 sps:$4 sm:$0xff]  }
  0xa6   :  { %1217 = vmatprep.subr.bf16.mxu0 %v3207_v9  ;;  %1299 = vmatprep.subr.bf16.mxu1 %v3210_v19  ;;  %v3268_v19 = vld [vmem:[#allocation7 + $0x2a8] ss:$16 sps:$4 sm:$0xff]  }
  0xa9   :  { %1218 = vmatpush1.bf16.msra.mxu0 %v3205_v12  ;;  %1300 = vmatpush1.bf16.msra.mxu1 %v3208_v21  ;;  %v3261_v12 = vld [vmem:[#allocation7 + $0x284] ss:$16 sps:$4 sm:$0xff]   ;;  %v3276_v21 = vld [vmem:[#allocation7 + $0x2cc] ss:$16 sps:$4 sm:$0xff]  }
  0xaa   :  { %1219 = vmatprep.subr.bf16.mxu0 %v3213_v13  ;;  %1301 = vmatprep.subr.bf16.mxu1 %v3216_v22  ;;  %v3264_v13 = vld [vmem:[#allocation7 + $0x28c] ss:$16 sps:$4 sm:$0xff]   ;;  %v3271_v22 = vld [vmem:[#allocation7 + $0x2c0] ss:$16 sps:$4 sm:$0xff]  }
  0xad   :  { %1220 = vmatpush1.bf16.msra.mxu0 %v3211_v16  ;;  %1302 = vmatpush1.bf16.msra.mxu1 %v3214_v23  ;;  %v3267_v16 = vld [vmem:[#allocation7 + $0x2a4] ss:$16 sps:$4 sm:$0xff]   ;;  %v3274_v23 = vld [vmem:[#allocation7 + $0x2c8] ss:$16 sps:$4 sm:$0xff]  }
  0xae   :  { %1221 = vmatprep.subr.bf16.mxu0 %v3219_v17  ;;  %1303 = vmatprep.subr.bf16.mxu1 %v3222_v24  ;;  %v3270_v17 = vld [vmem:[#allocation7 + $0x2ac] ss:$16 sps:$4 sm:$0xff]   ;;  %v3279_v24 = vld [vmem:[#allocation7 + $0x2e4] ss:$16 sps:$4 sm:$0xff]  }
  0xb1   :  { %1222 = vmatpush1.bf16.msra.mxu0 %v3217_v20  ;;  %1304 = vmatpush1.bf16.msra.mxu1 %v3220_v25  ;;  %v3273_v20 = vld [vmem:[#allocation7 + $0x2c4] ss:$16 sps:$4 sm:$0xff]   ;;  %v3282_v25 = vld [vmem:[#allocation7 + $0x2ec] ss:$16 sps:$4 sm:$0xff]  }
  0xb2   :  { %1223 = vmatprep.subr.bf16.mxu0 %v3225_v26  ;;  %1305 = vmatprep.subr.bf16.mxu1 %v3228_v27  ;;  %v3277_v26 = vld [vmem:[#allocation7 + $0x2e0] ss:$16 sps:$4 sm:$0xff]   ;;  %v3280_v27 = vld [vmem:[#allocation7 + $0x2e8] ss:$16 sps:$4 sm:$0xff]  }
  0xb5   :  { %1224 = vmatpush1.bf16.msra.mxu0 %v3223_v28  ;;  %1306 = vmatpush1.bf16.msra.mxu1 %v3226_v29  ;;  %v3285_v28 = vld [vmem:[#allocation7 + $0x304] ss:$16 sps:$4 sm:$0xff]   ;;  %v3288_v29 = vld [vmem:[#allocation7 + $0x30c] ss:$16 sps:$4 sm:$0xff]  }
  0xb6   :  { %1225 = vmatprep.subr.bf16.mxu0 %v3231_v30  ;;  %1307 = vmatprep.subr.bf16.mxu1 %v3234_v31  ;;  %v3283_v30 = vld [vmem:[#allocation7 + $0x300] ss:$16 sps:$4 sm:$0xff]   ;;  %v3286_v31 = vld [vmem:[#allocation7 + $0x308] ss:$16 sps:$4 sm:$0xff]  }
  0xb9   :  { %1226 = vmatpush1.bf16.msra.mxu0 %v3229_v32  ;;  %1308 = vmatpush1.bf16.msra.mxu1 %v3232_v33  ;;  %v3291_v32 = vld [vmem:[#allocation7 + $0x324] ss:$16 sps:$4 sm:$0xff]   ;;  %v3294_v33 = vld [vmem:[#allocation7 + $0x32c] ss:$16 sps:$4 sm:$0xff]  }
  0xba   :  { %1236 = vmatprep.subr.bf16.mxu0 %v3237_v34  ;;  %1318 = vmatprep.subr.bf16.mxu1 %v3240_v35  ;;  %v3289_v34 = vld [vmem:[#allocation7 + $0x320] ss:$16 sps:$4 sm:$0xff]   ;;  %v3292_v35 = vld [vmem:[#allocation7 + $0x328] ss:$16 sps:$4 sm:$0xff]  }
 0x14f   :  { %v349_v43 = vpop.f32.mrb[0].mxu0  ;;  %v3849_v63 = vpop.f32.mrb[0].mxu1 }
 0x150   :  { %v350_v44 = vadd.f32 %v349_v43, %v138_v41  ;;  %v351_v45 = vpop.f32.mrb[1].mxu0  ;;  %v392_v0 = vpop.f32.mrb[1].mxu1  ;;  %v3300_v41 = vld [vmem:[#allocation7 + $0x34c] ss:$16 sps:$4 sm:$0xff]   ;;  %v3298_v43 = vld [vmem:[#allocation7 + $0x348] ss:$16 sps:$4 sm:$0xff]  }
 0x151   :  { %v352_v46 = vadd.f32 %v351_v45, %v142_v42  ;;  %v353_v47 = vpop.f32.mrb[2].mxu0  ;;  %v393_v1 = vadd.f32 %v392_v0, %v150_v58  ;;  %v394_v2 = vpop.f32.mrb[2].mxu1  ;;  %v3295_v42 = vld [vmem:[#allocation7 + $0x340] ss:$16 sps:$4 sm:$0xff]   ;;  %v3306_v45 = vld [vmem:[#allocation7 + $0x36c] ss:$16 sps:$4 sm:$0xff]  }
 0x152   :  { %v397_v48 = vmax.f32 %v350_v44, 0.0  ;;  %v354_v49 = vpop.f32.mrb[3].mxu0  ;;  %v395_v5 = vpop.f32.mrb[3].mxu1  ;;  %v3303_v44 = vld [vmem:[#allocation7 + $0x364] ss:$16 sps:$4 sm:$0xff]  }
 0x153   :  { %v398_v50 = vmax.f32 %v352_v46, 0.0  ;;  %v400_v8 = vmax.f32 %v393_v1, 0.0  ;;  %v3301_v46 = vld [vmem:[#allocation7 + $0x360] ss:$16 sps:$4 sm:$0xff]   ;;  %v3304_v47 = vld [vmem:[#allocation7 + $0x368] ss:$16 sps:$4 sm:$0xff]  }
 0x154   :  { %v401_v55 = vpack.c.bf16 %v397_v48, %v397_v48  ;;  %v3309_v48 = vld [vmem:[#allocation7 + $0x384] ss:$16 sps:$4 sm:$0xff]   ;;  %v3312_v49 = vld [vmem:[#allocation7 + $0x38c] ss:$16 sps:$4 sm:$0xff]   ;;  %v3325_v2 = vld [vmem:[#allocation7 + $0x3e0] ss:$16 sps:$4 sm:$0xff]  }
 0x155   :  { %v402_v52 = vpack.c.bf16 %v398_v50, %v398_v50  ;;  %v404_v9 = vpack.c.bf16 %v400_v8, %v400_v8  ;;  %v3307_v50 = vld [vmem:[#allocation7 + $0x380] ss:$16 sps:$4 sm:$0xff]   ;;  %v3327_v0 = vld [vmem:[#allocation7 + $0x3e4] ss:$16 sps:$4 sm:$0xff]   ;;  %v3330_v1 = vld [vmem:[#allocation7 + $0x3ec] ss:$16 sps:$4 sm:$0xff]  }
 0x156   :  { %v3336_v5 = vld [vmem:[#allocation8 + $0xc] ss:$16 sps:$4 sm:$0xff]  }
 0x157   :  { %1227 = vmatprep.mubr.bf16.mxu0 %v402_v52  ;;  %1309 = vmatprep.mubr.bf16.mxu1 %v402_v52  ;;  %v3310_v52 = vld [vmem:[#allocation7 + $0x388] ss:$16 sps:$4 sm:$0xff]  }
 0x158   :  { %1228 = vmatmul.mubr.bf16.vlgmr.msra.gmra.mrb[4].mxu0 %v401_v55  ;;  %1310 = vmatmul.mubr.bf16.vlgmr.msra.gmra.mrb[4].mxu1 %v401_v55  ;;  %v3318_v55 = vld [vmem:[#allocation7 + $0x3ac] ss:$16 sps:$4 sm:$0xff]  }
 0x159   :  { %1237 = vmatpush1.bf16.msra.mxu0 %v3235_v53  ;;  %1319 = vmatpush1.bf16.msra.mxu1 %v3238_v54  ;;  %v3852_v53 = vsub.s32 2, %v3827_v37  ;;  %v3315_v54 = vld [vmem:[#allocation7 + $0x3a4] ss:$16 sps:$4 sm:$0xff]  }
 0x15a   :  { %1238 = vmatprep.subr.bf16.mxu0 %v3243_v56  ;;  %1320 = vmatprep.subr.bf16.mxu1 %v3246_v57  ;;  %v3313_v56 = vld [vmem:[#allocation7 + $0x3a0] ss:$16 sps:$4 sm:$0xff]   ;;  %v3316_v57 = vld [vmem:[#allocation7 + $0x3a8] ss:$16 sps:$4 sm:$0xff]  }
 0x15b   :  { %1268 = vmatprep.mubr.bf16.mxu0 %v404_v9  ;;  %1350 = vmatprep.mubr.bf16.mxu1 %v404_v9  ;;  %v146_v58 = vrot.slane %v3835_v39, %v3852_v53  ;;  %v3333_v39 = vld [vmem:[#allocation8 + $0x4] ss:$16 sps:$4 sm:$0xff]   ;;  %v3342_v9 = vld [vmem:[#allocation8 + $0x2c] ss:$16 sps:$4 sm:$0xff]  }
 0x15d   :  { %1239 = vmatpush1.bf16.msra.mxu0 %v3241_v59  ;;  %1321 = vmatpush1.bf16.msra.mxu1 %v3244_v60  ;;  %v3321_v59 = vld [vmem:[#allocation7 + $0x3c4] ss:$16 sps:$4 sm:$0xff]   ;;  %v3324_v60 = vld [vmem:[#allocation7 + $0x3cc] ss:$16 sps:$4 sm:$0xff]   ;;  %v391_v37 = vadd.f32 %v3849_v63, %v146_v58 }
 0x15e   :  { %1240 = vmatprep.subr.bf16.mxu0 %v3249_v61  ;;  %1322 = vmatprep.subr.bf16.mxu1 %v3252_v62  ;;  %v3319_v61 = vld [vmem:[#allocation7 + $0x3c0] ss:$16 sps:$4 sm:$0xff]   ;;  %v3322_v62 = vld [vmem:[#allocation7 + $0x3c8] ss:$16 sps:$4 sm:$0xff]   ;;  %v3339_v63 = vld [vmem:[#allocation8 + $0x24] ss:$16 sps:$4 sm:$0xff]  }
 0x15f   :  { %v3405_v58 = vld [vmem:[#allocation8 + $0x184] ss:$16 sps:$4 sm:$0xff]  }
 0x161   :  { %1241 = vmatpush1.bf16.msra.mxu0 %v3247_v3  ;;  %1323 = vmatpush1.bf16.msra.mxu1 %v3250_v4  ;;  %v3328_v3 = vld [vmem:[#allocation7 + $0x3e8] ss:$16 sps:$4 sm:$0xff]   ;;  %v399_v4 = vmax.f32 %v391_v37, 0.0  ;;  %v3414_v37 = vld [vmem:[#allocation8 + $0x1ac] ss:$16 sps:$4 sm:$0xff]  }
 0x162   :  { %1242 = vmatprep.subr.bf16.mxu0 %v3255_v6  ;;  %1324 = vmatprep.subr.bf16.mxu1 %v3258_v7  ;;  %v3331_v6 = vld [vmem:[#allocation8] ss:$16 sps:$4 sm:$0xff]   ;;  %v3334_v7 = vld [vmem:[#allocation8 + $0x8] ss:$16 sps:$4 sm:$0xff]  }
 0x163   :  { %v403_v8 = vpack.c.bf16 %v399_v4, %v399_v4  ;;  %v3415_v4 = vld [vmem:[#allocation8 + $0x1c0] ss:$16 sps:$4 sm:$0xff]  }
 0x165   :  { %1243 = vmatpush1.bf16.msra.mxu0 %v3253_v10  ;;  %1325 = vmatpush1.bf16.msra.mxu1 %v3256_v11  ;;  %v3337_v10 = vld [vmem:[#allocation8 + $0x20] ss:$16 sps:$4 sm:$0xff]   ;;  %v3340_v11 = vld [vmem:[#allocation8 + $0x28] ss:$16 sps:$4 sm:$0xff]  }
 0x166   :  { %1244 = vmatprep.subr.bf16.mxu0 %v3261_v12  ;;  %1326 = vmatprep.subr.bf16.mxu1 %v3264_v13  ;;  %v3345_v12 = vld [vmem:[#allocation8 + $0x44] ss:$16 sps:$4 sm:$0xff]   ;;  %v3348_v13 = vld [vmem:[#allocation8 + $0x4c] ss:$16 sps:$4 sm:$0xff]  }
 0x169   :  { %1245 = vmatpush1.bf16.msra.mxu0 %v3259_v14  ;;  %1327 = vmatpush1.bf16.msra.mxu1 %v3262_v15  ;;  %v3343_v14 = vld [vmem:[#allocation8 + $0x40] ss:$16 sps:$4 sm:$0xff]   ;;  %v3346_v15 = vld [vmem:[#allocation8 + $0x48] ss:$16 sps:$4 sm:$0xff]  }
 0x16a   :  { %1246 = vmatprep.subr.bf16.mxu0 %v3267_v16  ;;  %1328 = vmatprep.subr.bf16.mxu1 %v3270_v17  ;;  %v3351_v16 = vld [vmem:[#allocation8 + $0x64] ss:$16 sps:$4 sm:$0xff]   ;;  %v3354_v17 = vld [vmem:[#allocation8 + $0x6c] ss:$16 sps:$4 sm:$0xff]  }
 0x16d   :  { %1247 = vmatpush1.bf16.msra.mxu0 %v3265_v18  ;;  %1329 = vmatpush1.bf16.msra.mxu1 %v3268_v19  ;;  %v3349_v18 = vld [vmem:[#allocation8 + $0x60] ss:$16 sps:$4 sm:$0xff]   ;;  %v3352_v19 = vld [vmem:[#allocation8 + $0x68] ss:$16 sps:$4 sm:$0xff]  }
 0x16e   :  { %1248 = vmatprep.subr.bf16.mxu0 %v3273_v20  ;;  %1330 = vmatprep.subr.bf16.mxu1 %v3276_v21  ;;  %v3357_v20 = vld [vmem:[#allocation8 + $0x84] ss:$16 sps:$4 sm:$0xff]   ;;  %v3360_v21 = vld [vmem:[#allocation8 + $0x8c] ss:$16 sps:$4 sm:$0xff]  }
 0x171   :  { %1249 = vmatpush1.bf16.msra.mxu0 %v3271_v22  ;;  %1331 = vmatpush1.bf16.msra.mxu1 %v3274_v23  ;;  %v3355_v22 = vld [vmem:[#allocation8 + $0x80] ss:$16 sps:$4 sm:$0xff]   ;;  %v3358_v23 = vld [vmem:[#allocation8 + $0x88] ss:$16 sps:$4 sm:$0xff]  }
 0x172   :  { %1250 = vmatprep.subr.bf16.mxu0 %v3279_v24  ;;  %1332 = vmatprep.subr.bf16.mxu1 %v3282_v25  ;;  %v3363_v24 = vld [vmem:[#allocation8 + $0xa4] ss:$16 sps:$4 sm:$0xff]   ;;  %v3366_v25 = vld [vmem:[#allocation8 + $0xac] ss:$16 sps:$4 sm:$0xff]  }
 0x175   :  { %1251 = vmatpush1.bf16.msra.mxu0 %v3277_v26  ;;  %1333 = vmatpush1.bf16.msra.mxu1 %v3280_v27  ;;  %v3361_v26 = vld [vmem:[#allocation8 + $0xa0] ss:$16 sps:$4 sm:$0xff]   ;;  %v3364_v27 = vld [vmem:[#allocation8 + $0xa8] ss:$16 sps:$4 sm:$0xff]  }
 0x176   :  { %1252 = vmatprep.subr.bf16.mxu0 %v3285_v28  ;;  %1334 = vmatprep.subr.bf16.mxu1 %v3288_v29  ;;  %v3369_v28 = vld [vmem:[#allocation8 + $0xc4] ss:$16 sps:$4 sm:$0xff]   ;;  %v3372_v29 = vld [vmem:[#allocation8 + $0xcc] ss:$16 sps:$4 sm:$0xff]  }
 0x179   :  { %1253 = vmatpush1.bf16.msra.mxu0 %v3283_v30  ;;  %1335 = vmatpush1.bf16.msra.mxu1 %v3286_v31  ;;  %v3367_v30 = vld [vmem:[#allocation8 + $0xc0] ss:$16 sps:$4 sm:$0xff]   ;;  %v3370_v31 = vld [vmem:[#allocation8 + $0xc8] ss:$16 sps:$4 sm:$0xff]  }
 0x17a   :  { %1254 = vmatprep.subr.bf16.mxu0 %v3291_v32  ;;  %1336 = vmatprep.subr.bf16.mxu1 %v3294_v33  ;;  %v3375_v32 = vld [vmem:[#allocation8 + $0xe4] ss:$16 sps:$4 sm:$0xff]   ;;  %v3378_v33 = vld [vmem:[#allocation8 + $0xec] ss:$16 sps:$4 sm:$0xff]  }
 0x17d   :  { %1255 = vmatpush1.bf16.msra.mxu0 %v3289_v34  ;;  %1337 = vmatpush1.bf16.msra.mxu1 %v3292_v35  ;;  %v3373_v34 = vld [vmem:[#allocation8 + $0xe0] ss:$16 sps:$4 sm:$0xff]   ;;  %v3376_v35 = vld [vmem:[#allocation8 + $0xe8] ss:$16 sps:$4 sm:$0xff]  }
 0x17e   :  { %1256 = vmatprep.subr.bf16.mxu0 %v3297_v36  ;;  %1338 = vmatprep.subr.bf16.mxu1 %v3300_v41  ;;  %v3381_v36 = vld [vmem:[#allocation8 + $0x104] ss:$16 sps:$4 sm:$0xff]   ;;  %v3384_v41 = vld [vmem:[#allocation8 + $0x10c] ss:$16 sps:$4 sm:$0xff]  }
 0x181   :  { %1257 = vmatpush1.bf16.msra.mxu0 %v3295_v42  ;;  %1339 = vmatpush1.bf16.msra.mxu1 %v3298_v43  ;;  %v3379_v42 = vld [vmem:[#allocation8 + $0x100] ss:$16 sps:$4 sm:$0xff]   ;;  %v3382_v43 = vld [vmem:[#allocation8 + $0x108] ss:$16 sps:$4 sm:$0xff]  }
 0x182   :  { %1258 = vmatprep.subr.bf16.mxu0 %v3303_v44  ;;  %1340 = vmatprep.subr.bf16.mxu1 %v3306_v45  ;;  %v3387_v44 = vld [vmem:[#allocation8 + $0x124] ss:$16 sps:$4 sm:$0xff]   ;;  %v3390_v45 = vld [vmem:[#allocation8 + $0x12c] ss:$16 sps:$4 sm:$0xff]  }
 0x185   :  { %1259 = vmatpush1.bf16.msra.mxu0 %v3301_v46  ;;  %1341 = vmatpush1.bf16.msra.mxu1 %v3304_v47  ;;  %v3385_v46 = vld [vmem:[#allocation8 + $0x120] ss:$16 sps:$4 sm:$0xff]   ;;  %v3388_v47 = vld [vmem:[#allocation8 + $0x128] ss:$16 sps:$4 sm:$0xff]  }
 0x186   :  { %1260 = vmatprep.subr.bf16.mxu0 %v3309_v48  ;;  %1342 = vmatprep.subr.bf16.mxu1 %v3312_v49  ;;  %v3393_v48 = vld [vmem:[#allocation8 + $0x144] ss:$16 sps:$4 sm:$0xff]   ;;  %v3396_v49 = vld [vmem:[#allocation8 + $0x14c] ss:$16 sps:$4 sm:$0xff]  }
 0x189   :  { %1261 = vmatpush1.bf16.msra.mxu0 %v3307_v50  ;;  %1343 = vmatpush1.bf16.msra.mxu1 %v3310_v52  ;;  %v3391_v50 = vld [vmem:[#allocation8 + $0x140] ss:$16 sps:$4 sm:$0xff]   ;;  %v3394_v52 = vld [vmem:[#allocation8 + $0x148] ss:$16 sps:$4 sm:$0xff]  }
 0x18a   :  { %1262 = vmatprep.subr.bf16.mxu0 %v3315_v54  ;;  %1344 = vmatprep.subr.bf16.mxu1 %v3318_v55  ;;  %v3399_v54 = vld [vmem:[#allocation8 + $0x164] ss:$16 sps:$4 sm:$0xff]   ;;  %v3402_v55 = vld [vmem:[#allocation8 + $0x16c] ss:$16 sps:$4 sm:$0xff]  }
 0x18d   :  { %1263 = vmatpush1.bf16.msra.mxu0 %v3313_v56  ;;  %1345 = vmatpush1.bf16.msra.mxu1 %v3316_v57  ;;  %v3397_v56 = vld [vmem:[#allocation8 + $0x160] ss:$16 sps:$4 sm:$0xff]   ;;  %v3400_v57 = vld [vmem:[#allocation8 + $0x168] ss:$16 sps:$4 sm:$0xff]  }
 0x18e   :  { %1264 = vmatprep.subr.bf16.mxu0 %v3321_v59  ;;  %1346 = vmatprep.subr.bf16.mxu1 %v3324_v60  ;;  %v3408_v59 = vld [vmem:[#allocation8 + $0x18c] ss:$16 sps:$4 sm:$0xff]   ;;  %v3403_v60 = vld [vmem:[#allocation8 + $0x180] ss:$16 sps:$4 sm:$0xff]  }
 0x191   :  { %1265 = vmatpush1.bf16.msra.mxu0 %v3319_v61  ;;  %1347 = vmatpush1.bf16.msra.mxu1 %v3322_v62  ;;  %v3406_v61 = vld [vmem:[#allocation8 + $0x188] ss:$16 sps:$4 sm:$0xff]   ;;  %v3411_v62 = vld [vmem:[#allocation8 + $0x1a4] ss:$16 sps:$4 sm:$0xff]  }
 0x192   :  { %1266 = vmatprep.subr.bf16.mxu0 %v3327_v0  ;;  %1348 = vmatprep.subr.bf16.mxu1 %v3330_v1  ;;  %v3409_v0 = vld [vmem:[#allocation8 + $0x1a0] ss:$16 sps:$4 sm:$0xff]   ;;  %v3412_v1 = vld [vmem:[#allocation8 + $0x1a8] ss:$16 sps:$4 sm:$0xff]  }
 0x195   :  { %1267 = vmatpush1.bf16.msra.mxu0 %v3325_v2  ;;  %1349 = vmatpush1.bf16.msra.mxu1 %v3328_v3  ;;  %v3417_v2 = vld [vmem:[#allocation8 + $0x1c4] ss:$16 sps:$4 sm:$0xff]   ;;  %v3420_v3 = vld [vmem:[#allocation8 + $0x1cc] ss:$16 sps:$4 sm:$0xff]  }
 0x196   :  { %2157 = vmatprep.subr.bf16.mxu0 %v3333_v39  ;;  %2239 = vmatprep.subr.bf16.mxu1 %v3336_v5  ;;  %v3418_v39 = vld [vmem:[#allocation8 + $0x1c8] ss:$16 sps:$4 sm:$0xff]   ;;  %v3423_v5 = vld [vmem:[#allocation8 + $0x1e4] ss:$16 sps:$4 sm:$0xff]  }
 0x198   :  { %1269 = vmatmul.mubr.bf16.vlgmr.msra.gmra.mrb[4].mxu0 %v403_v8  ;;  %1351 = vmatmul.mubr.bf16.vlgmr.msra.gmra.mrb[4].mxu1 %v403_v8  ;;  %v3424_v8 = vld [vmem:[#allocation8 + $0x1e8] ss:$16 sps:$4 sm:$0xff]  }
 0x199   :  { %2158 = vmatpush1.bf16.msra.mxu0 %v3331_v6  ;;  %2240 = vmatpush1.bf16.msra.mxu1 %v3334_v7  ;;  %v3426_v6 = vld [vmem:[#allocation8 + $0x1ec] ss:$16 sps:$4 sm:$0xff]   ;;  %v3421_v7 = vld [vmem:[#allocation8 + $0x1e0] ss:$16 sps:$4 sm:$0xff]  }
 0x19a   :  { %2159 = vmatprep.subr.bf16.mxu0 %v3339_v63  ;;  %2241 = vmatprep.subr.bf16.mxu1 %v3342_v9  ;;  %v3429_v63 = vld [vmem:[#allocation8 + $0x204] ss:$16 sps:$4 sm:$0xff]   ;;  %v3432_v9 = vld [vmem:[#allocation8 + $0x20c] ss:$16 sps:$4 sm:$0xff]  }
 0x19d   :  { %2160 = vmatpush1.bf16.msra.mxu0 %v3337_v10  ;;  %2242 = vmatpush1.bf16.msra.mxu1 %v3340_v11  ;;  %v3860_v10 = vld [vmem:[%s3899_s4] sm:$0xf] }
 0x19e   :  { %2161 = vmatprep.subr.bf16.mxu0 %v3345_v12  ;;  %2243 = vmatprep.subr.bf16.mxu1 %v3348_v13  ;;  %v538_v11 = vrot.slane %v3860_v10, %v3830_v38  ;;  %v542_v12 = vrot.slane %v3860_v10, %v3838_v40  ;;  %v550_v13 = vrot.slane %v3860_v10, %v3845_v51 }
 0x1a1   :  { %2162 = vmatpush1.bf16.msra.mxu0 %v3343_v14  ;;  %2244 = vmatpush1.bf16.msra.mxu1 %v3346_v15 }
 0x1a2   :  { %2163 = vmatprep.subr.bf16.mxu0 %v3351_v16  ;;  %2245 = vmatprep.subr.bf16.mxu1 %v3354_v17 }
 0x1a5   :  { %2164 = vmatpush1.bf16.msra.mxu0 %v3349_v18  ;;  %2246 = vmatpush1.bf16.msra.mxu1 %v3352_v19 }
 0x1a6   :  { %2165 = vmatprep.subr.bf16.mxu0 %v3357_v20  ;;  %2247 = vmatprep.subr.bf16.mxu1 %v3360_v21 }
 0x1a9   :  { %2166 = vmatpush1.bf16.msra.mxu0 %v3355_v22  ;;  %2248 = vmatpush1.bf16.msra.mxu1 %v3358_v23 }
 0x1aa   :  { %2167 = vmatprep.subr.bf16.mxu0 %v3363_v24  ;;  %2249 = vmatprep.subr.bf16.mxu1 %v3366_v25 }
 0x1ad   :  { %2168 = vmatpush1.bf16.msra.mxu0 %v3361_v26  ;;  %2250 = vmatpush1.bf16.msra.mxu1 %v3364_v27 }
 0x1ae   :  { %2169 = vmatprep.subr.bf16.mxu0 %v3369_v28  ;;  %2251 = vmatprep.subr.bf16.mxu1 %v3372_v29  ;;  %v3427_v29 = vld [vmem:[#allocation8 + $0x200] ss:$16 sps:$4 sm:$0xff]  }
 0x1b1   :  { %2170 = vmatpush1.bf16.msra.mxu0 %v3367_v30  ;;  %2252 = vmatpush1.bf16.msra.mxu1 %v3370_v31  ;;  %v3430_v30 = vld [vmem:[#allocation8 + $0x208] ss:$16 sps:$4 sm:$0xff]  }
 0x1b2   :  { %2171 = vmatprep.subr.bf16.mxu0 %v3375_v32  ;;  %2253 = vmatprep.subr.bf16.mxu1 %v3378_v33  ;;  %v3435_v32 = vld [vmem:[#allocation8 + $0x224] ss:$16 sps:$4 sm:$0xff]   ;;  %v3438_v33 = vld [vmem:[#allocation8 + $0x22c] ss:$16 sps:$4 sm:$0xff]  }
 0x1b5   :  { %2172 = vmatpush1.bf16.msra.mxu0 %v3373_v34  ;;  %2254 = vmatpush1.bf16.msra.mxu1 %v3376_v35  ;;  %v3433_v35 = vld [vmem:[#allocation8 + $0x220] ss:$16 sps:$4 sm:$0xff]  }
 0x1b6   :  { %2173 = vmatprep.subr.bf16.mxu0 %v3381_v36  ;;  %2255 = vmatprep.subr.bf16.mxu1 %v3384_v41  ;;  %v3436_v36 = vld [vmem:[#allocation8 + $0x228] ss:$16 sps:$4 sm:$0xff]   ;;  %v3441_v41 = vld [vmem:[#allocation8 + $0x244] ss:$16 sps:$4 sm:$0xff]  }
 0x1b9   :  { %2174 = vmatpush1.bf16.msra.mxu0 %v3379_v42  ;;  %2256 = vmatpush1.bf16.msra.mxu1 %v3382_v43  ;;  %v3444_v42 = vld [vmem:[#allocation8 + $0x24c] ss:$16 sps:$4 sm:$0xff]   ;;  %v3439_v43 = vld [vmem:[#allocation8 + $0x240] ss:$16 sps:$4 sm:$0xff]  }
 0x1ba   :  { %2175 = vmatprep.subr.bf16.mxu0 %v3387_v44  ;;  %2257 = vmatprep.subr.bf16.mxu1 %v3390_v45  ;;  %v3442_v44 = vld [vmem:[#allocation8 + $0x248] ss:$16 sps:$4 sm:$0xff]   ;;  %v3447_v45 = vld [vmem:[#allocation8 + $0x264] ss:$16 sps:$4 sm:$0xff]  }
 0x1bd   :  { %2176 = vmatpush1.bf16.msra.mxu0 %v3385_v46  ;;  %2258 = vmatpush1.bf16.msra.mxu1 %v3388_v47  ;;  %v3450_v46 = vld [vmem:[#allocation8 + $0x26c] ss:$16 sps:$4 sm:$0xff]   ;;  %v3445_v47 = vld [vmem:[#allocation8 + $0x260] ss:$16 sps:$4 sm:$0xff]  }
 0x1be   :  { %2177 = vmatprep.subr.bf16.mxu0 %v3393_v48  ;;  %2259 = vmatprep.subr.bf16.mxu1 %v3396_v49  ;;  %v3448_v48 = vld [vmem:[#allocation8 + $0x268] ss:$16 sps:$4 sm:$0xff]   ;;  %v3453_v49 = vld [vmem:[#allocation8 + $0x284] ss:$16 sps:$4 sm:$0xff]  }
 0x1c1   :  { %2178 = vmatpush1.bf16.msra.mxu0 %v3391_v50  ;;  %2260 = vmatpush1.bf16.msra.mxu1 %v3394_v52  ;;  %v3456_v50 = vld [vmem:[#allocation8 + $0x28c] ss:$16 sps:$4 sm:$0xff]   ;;  %v3451_v52 = vld [vmem:[#allocation8 + $0x280] ss:$16 sps:$4 sm:$0xff]  }
 0x1c2   :  { %2179 = vmatprep.subr.bf16.mxu0 %v3399_v54  ;;  %2261 = vmatprep.subr.bf16.mxu1 %v3402_v55  ;;  %v3454_v54 = vld [vmem:[#allocation8 + $0x288] ss:$16 sps:$4 sm:$0xff]   ;;  %v3459_v55 = vld [vmem:[#allocation8 + $0x2a4] ss:$16 sps:$4 sm:$0xff]  }
 0x1c5   :  { %2180 = vmatpush1.bf16.msra.mxu0 %v3397_v56  ;;  %2262 = vmatpush1.bf16.msra.mxu1 %v3400_v57  ;;  %v3462_v56 = vld [vmem:[#allocation8 + $0x2ac] ss:$16 sps:$4 sm:$0xff]   ;;  %v3457_v57 = vld [vmem:[#allocation8 + $0x2a0] ss:$16 sps:$4 sm:$0xff]  }
 0x1c6   :  { %2181 = vmatprep.subr.bf16.mxu0 %v3405_v58  ;;  %2263 = vmatprep.subr.bf16.mxu1 %v3408_v59  ;;  %v3460_v58 = vld [vmem:[#allocation8 + $0x2a8] ss:$16 sps:$4 sm:$0xff]   ;;  %v3465_v59 = vld [vmem:[#allocation8 + $0x2c4] ss:$16 sps:$4 sm:$0xff]  }
 0x1c9   :  { %2182 = vmatpush1.bf16.msra.mxu0 %v3403_v60  ;;  %2264 = vmatpush1.bf16.msra.mxu1 %v3406_v61  ;;  %v3468_v60 = vld [vmem:[#allocation8 + $0x2cc] ss:$16 sps:$4 sm:$0xff]   ;;  %v3463_v61 = vld [vmem:[#allocation8 + $0x2c0] ss:$16 sps:$4 sm:$0xff]  }
 0x1ca   :  { %2183 = vmatprep.subr.bf16.mxu0 %v3411_v62  ;;  %2265 = vmatprep.subr.bf16.mxu1 %v3414_v37  ;;  %v3466_v62 = vld [vmem:[#allocation8 + $0x2c8] ss:$16 sps:$4 sm:$0xff]   ;;  %v3471_v37 = vld [vmem:[#allocation8 + $0x2e4] ss:$16 sps:$4 sm:$0xff]  }
 0x1cd   :  { %2184 = vmatpush1.bf16.msra.mxu0 %v3409_v0  ;;  %2266 = vmatpush1.bf16.msra.mxu1 %v3412_v1  ;;  %v3474_v0 = vld [vmem:[#allocation8 + $0x2ec] ss:$16 sps:$4 sm:$0xff]   ;;  %v3469_v1 = vld [vmem:[#allocation8 + $0x2e0] ss:$16 sps:$4 sm:$0xff]  }
 0x1ce   :  { %2185 = vmatprep.subr.bf16.mxu0 %v3417_v2  ;;  %2267 = vmatprep.subr.bf16.mxu1 %v3420_v3  ;;  %v3472_v2 = vld [vmem:[#allocation8 + $0x2e8] ss:$16 sps:$4 sm:$0xff]   ;;  %v3477_v3 = vld [vmem:[#allocation8 + $0x304] ss:$16 sps:$4 sm:$0xff]  }
 0x1d1   :  { %2186 = vmatpush1.bf16.msra.mxu0 %v3415_v4  ;;  %2268 = vmatpush1.bf16.msra.mxu1 %v3418_v39  ;;  %v3480_v4 = vld [vmem:[#allocation8 + $0x30c] ss:$16 sps:$4 sm:$0xff]   ;;  %v3475_v39 = vld [vmem:[#allocation8 + $0x300] ss:$16 sps:$4 sm:$0xff]  }
 0x1d2   :  { %2187 = vmatprep.subr.bf16.mxu0 %v3423_v5  ;;  %2269 = vmatprep.subr.bf16.mxu1 %v3426_v6  ;;  %v3478_v5 = vld [vmem:[#allocation8 + $0x308] ss:$16 sps:$4 sm:$0xff]   ;;  %v3483_v6 = vld [vmem:[#allocation8 + $0x324] ss:$16 sps:$4 sm:$0xff]  }
 0x1d5   :  { %2188 = vmatpush1.bf16.msra.mxu0 %v3421_v7  ;;  %2270 = vmatpush1.bf16.msra.mxu1 %v3424_v8  ;;  %v3486_v7 = vld [vmem:[#allocation8 + $0x32c] ss:$16 sps:$4 sm:$0xff]   ;;  %v3481_v8 = vld [vmem:[#allocation8 + $0x320] ss:$16 sps:$4 sm:$0xff]  }
 0x1d6   :  { %2198 = vmatprep.subr.bf16.mxu0 %v3429_v63  ;;  %2280 = vmatprep.subr.bf16.mxu1 %v3432_v9  ;;  %v3484_v63 = vld [vmem:[#allocation8 + $0x328] ss:$16 sps:$4 sm:$0xff]   ;;  %v3489_v9 = vld [vmem:[#allocation8 + $0x344] ss:$16 sps:$4 sm:$0xff]  }
 0x26b   :  { %v1270_v14 = vpop.f32.mrb[4].mxu0  ;;  %v3868_v15 = vpop.f32.mrb[4].mxu1 }
 0x26c   :  { %v3056_v16 = vadd.f32 %v1270_v14, %v538_v11  ;;  %v1272_v17 = vpop.f32.mrb[5].mxu0  ;;  %v1354_v18 = vpop.f32.mrb[5].mxu1  ;;  %v3492_v11 = vld [vmem:[#allocation8 + $0x34c] ss:$16 sps:$4 sm:$0xff]   ;;  %v3495_v14 = vld [vmem:[#allocation8 + $0x364] ss:$16 sps:$4 sm:$0xff]  }
 0x26d   :  { %v3057_v19 = vadd.f32 %v1272_v17, %v542_v12  ;;  %v3059_v20 = vadd.f32 %v1354_v18, %v550_v13  ;;  %v1274_v21 = vpop.f32.mrb[6].mxu0  ;;  %v1356_v22 = vpop.f32.mrb[6].mxu1  ;;  %v3487_v12 = vld [vmem:[#allocation8 + $0x340] ss:$16 sps:$4 sm:$0xff]   ;;  %v3490_v13 = vld [vmem:[#allocation8 + $0x348] ss:$16 sps:$4 sm:$0xff]  }
 0x26e   :  { %v1359_v23 = vmax.f32 %v3056_v16, 0.0  ;;  %v1275_v24 = vpop.f32.mrb[7].mxu0  ;;  %v1357_v25 = vpop.f32.mrb[7].mxu1  ;;  %v3498_v16 = vld [vmem:[#allocation8 + $0x36c] ss:$16 sps:$4 sm:$0xff]  }
 0x26f   :  { %v1360_v26 = vmax.f32 %v3057_v19, 0.0  ;;  %v1362_v27 = vmax.f32 %v3059_v20, 0.0  ;;  %v3493_v17 = vld [vmem:[#allocation8 + $0x360] ss:$16 sps:$4 sm:$0xff]   ;;  %v3496_v18 = vld [vmem:[#allocation8 + $0x368] ss:$16 sps:$4 sm:$0xff]  }
 0x270   :  { %v1363_v31 = vpack.c.bf16 %v1359_v23, %v1359_v23  ;;  %v3501_v19 = vld [vmem:[#allocation8 + $0x384] ss:$16 sps:$4 sm:$0xff]   ;;  %v3504_v20 = vld [vmem:[#allocation8 + $0x38c] ss:$16 sps:$4 sm:$0xff]   ;;  %v3499_v21 = vld [vmem:[#allocation8 + $0x380] ss:$16 sps:$4 sm:$0xff]  }
 0x271   :  { %v1364_v28 = vpack.c.bf16 %v1360_v26, %v1360_v26  ;;  %v1366_v34 = vpack.c.bf16 %v1362_v27, %v1362_v27  ;;  %v3502_v22 = vld [vmem:[#allocation8 + $0x388] ss:$16 sps:$4 sm:$0xff]   ;;  %v3507_v23 = vld [vmem:[#allocation8 + $0x3a4] ss:$16 sps:$4 sm:$0xff]   ;;  %v3510_v24 = vld [vmem:[#allocation8 + $0x3ac] ss:$16 sps:$4 sm:$0xff]   ;;  %v546_v27 = vrot.slane %v3860_v10, %v3852_v53 }
 0x272   :  { %v3505_v25 = vld [vmem:[#allocation8 + $0x3a0] ss:$16 sps:$4 sm:$0xff]   ;;  %v3508_v26 = vld [vmem:[#allocation8 + $0x3a8] ss:$16 sps:$4 sm:$0xff]  }
 0x273   :  { %2189 = vmatprep.mubr.bf16.mxu0 %v1364_v28  ;;  %2271 = vmatprep.mubr.bf16.mxu1 %v1364_v28  ;;  %v3513_v28 = vld [vmem:[#allocation8 + $0x3c4] ss:$16 sps:$4 sm:$0xff]  }
 0x274   :  { %2190 = vmatmul.mubr.bf16.vlgmr.msra.gmra.mrb[8].mxu0 %v1363_v31  ;;  %2272 = vmatmul.mubr.bf16.vlgmr.msra.gmra.mrb[8].mxu1 %v1363_v31  ;;  %v3514_v31 = vld [vmem:[#allocation8 + $0x3c8] ss:$16 sps:$4 sm:$0xff]   ;;  %v3523_v10 = vld [vmem:[#allocation10 + $0x40] sm:$0xff]  }
 0x275   :  { %2199 = vmatpush1.bf16.msra.mxu0 %v3427_v29  ;;  %2281 = vmatpush1.bf16.msra.mxu1 %v3430_v30  ;;  %v3516_v29 = vld [vmem:[#allocation8 + $0x3cc] ss:$16 sps:$4 sm:$0xff]   ;;  %v3511_v30 = vld [vmem:[#allocation8 + $0x3c0] ss:$16 sps:$4 sm:$0xff]  }
 0x276   :  { %2230 = vmatprep.mubr.bf16.mxu0 %v1366_v34  ;;  %2312 = vmatprep.mubr.bf16.mxu1 %v1366_v34  ;;  %v3522_v34 = vld [vmem:[#allocation8 + $0x3ec] ss:$16 sps:$4 sm:$0xff]  }
 0x277   :  { %2200 = vmatprep.subr.bf16.mxu0 %v3435_v32  ;;  %2282 = vmatprep.subr.bf16.mxu1 %v3438_v33  ;;  %v3058_v32 = vadd.f32 %v3868_v15, %v546_v27  ;;  %v3519_v33 = vld [vmem:[#allocation8 + $0x3e4] ss:$16 sps:$4 sm:$0xff]   ;;  %v3527_v15 = vld [vmem:[#allocation10 + $0x48] sm:$0xff]  }
 0x279   :  { %2201 = vmatpush1.bf16.msra.mxu0 %v3433_v35  ;;  %2283 = vmatpush1.bf16.msra.mxu1 %v3436_v36  ;;  %v3517_v35 = vld [vmem:[#allocation8 + $0x3e0] ss:$16 sps:$4 sm:$0xff]   ;;  %v3520_v36 = vld [vmem:[#allocation8 + $0x3e8] ss:$16 sps:$4 sm:$0xff]  }
 0x27a   :  { %2202 = vmatprep.subr.bf16.mxu0 %v3441_v41  ;;  %2284 = vmatprep.subr.bf16.mxu1 %v3444_v42  ;;  %v1361_v41 = vmax.f32 %v3058_v32, 0.0  ;;  %v3524_v42 = vld [vmem:[#allocation10 + $0xc0] sm:$0xff]  }
 0x27d   :  { %2203 = vmatpush1.bf16.msra.mxu0 %v3439_v43  ;;  %2285 = vmatpush1.bf16.msra.mxu1 %v3442_v44  ;;  %v3525_v43 = vld [vmem:[#allocation10] sm:$0xff]  }
 0x27e   :  { %2204 = vmatprep.subr.bf16.mxu0 %v3447_v45  ;;  %2286 = vmatprep.subr.bf16.mxu1 %v3450_v46  ;;  %v3526_v44 = vld [vmem:[#allocation10 + $0x80] sm:$0xff]   ;;  %v1365_v45 = vpack.c.bf16 %v1361_v41, %v1361_v41  ;;  %v3528_v46 = vld [vmem:[#allocation10 + $0xc8] sm:$0xff]  }
 0x281   :  { %2205 = vmatpush1.bf16.msra.mxu0 %v3445_v47  ;;  %2287 = vmatpush1.bf16.msra.mxu1 %v3448_v48  ;;  %v3529_v47 = vld [vmem:[#allocation10 + $0x8] sm:$0xff]  }
 0x282   :  { %2206 = vmatprep.subr.bf16.mxu0 %v3453_v49  ;;  %2288 = vmatprep.subr.bf16.mxu1 %v3456_v50  ;;  %v3530_v48 = vld [vmem:[#allocation10 + $0x88] sm:$0xff]   ;;  %v3531_v49 = vld [vmem:[#allocation10 + $0x50] sm:$0xff]  }
 0x283   :  { %v3532_v50 = vld [vmem:[#allocation10 + $0xd0] sm:$0xff]  }
 0x285   :  { %2207 = vmatpush1.bf16.msra.mxu0 %v3451_v52  ;;  %2289 = vmatpush1.bf16.msra.mxu1 %v3454_v54  ;;  %v3533_v52 = vld [vmem:[#allocation10 + $0x10] sm:$0xff]  }
 0x286   :  { %2208 = vmatprep.subr.bf16.mxu0 %v3459_v55  ;;  %2290 = vmatprep.subr.bf16.mxu1 %v3462_v56  ;;  %v3534_v54 = vld [vmem:[#allocation10 + $0x90] sm:$0xff]   ;;  %v3535_v55 = vld [vmem:[#allocation10 + $0x58] sm:$0xff]  }
 0x287   :  { %v3536_v56 = vld [vmem:[#allocation10 + $0xd8] sm:$0xff]  }
 0x289   :  { %2209 = vmatpush1.bf16.msra.mxu0 %v3457_v57  ;;  %2291 = vmatpush1.bf16.msra.mxu1 %v3460_v58  ;;  %v3537_v57 = vld [vmem:[#allocation10 + $0x18] sm:$0xff]  }
 0x28a   :  { %2210 = vmatprep.subr.bf16.mxu0 %v3465_v59  ;;  %2292 = vmatprep.subr.bf16.mxu1 %v3468_v60  ;;  %v3538_v58 = vld [vmem:[#allocation10 + $0x98] sm:$0xff]   ;;  %v3539_v59 = vld [vmem:[#allocation10 + $0x60] sm:$0xff]  }
 0x28b   :  { %v3540_v60 = vld [vmem:[#allocation10 + $0xe0] sm:$0xff]  }
 0x28d   :  { %2211 = vmatpush1.bf16.msra.mxu0 %v3463_v61  ;;  %2293 = vmatpush1.bf16.msra.mxu1 %v3466_v62  ;;  %v3541_v61 = vld [vmem:[#allocation10 + $0x20] sm:$0xff]  }
 0x28e   :  { %2212 = vmatprep.subr.bf16.mxu0 %v3471_v37  ;;  %2294 = vmatprep.subr.bf16.mxu1 %v3474_v0  ;;  %v3542_v62 = vld [vmem:[#allocation10 + $0xa0] sm:$0xff]   ;;  %v3543_v37 = vld [vmem:[#allocation10 + $0x68] sm:$0xff]  }
 0x28f   :  { %v3544_v0 = vld [vmem:[#allocation10 + $0xe8] sm:$0xff]  }
 0x291   :  { %2213 = vmatpush1.bf16.msra.mxu0 %v3469_v1  ;;  %2295 = vmatpush1.bf16.msra.mxu1 %v3472_v2  ;;  %v3545_v1 = vld [vmem:[#allocation10 + $0x28] sm:$0xff]  }
 0x292   :  { %2214 = vmatprep.subr.bf16.mxu0 %v3477_v3  ;;  %2296 = vmatprep.subr.bf16.mxu1 %v3480_v4  ;;  %v3546_v2 = vld [vmem:[#allocation10 + $0xa8] sm:$0xff]   ;;  %v3547_v3 = vld [vmem:[#allocation10 + $0x70] sm:$0xff]  }
 0x293   :  { %v3548_v4 = vld [vmem:[#allocation10 + $0xf0] sm:$0xff]  }
 0x295   :  { %2215 = vmatpush1.bf16.msra.mxu0 %v3475_v39  ;;  %2297 = vmatpush1.bf16.msra.mxu1 %v3478_v5  ;;  %v3549_v39 = vld [vmem:[#allocation10 + $0x30] sm:$0xff]  }
 0x296   :  { %2216 = vmatprep.subr.bf16.mxu0 %v3483_v6  ;;  %2298 = vmatprep.subr.bf16.mxu1 %v3486_v7  ;;  %v3550_v5 = vld [vmem:[#allocation10 + $0xb0] sm:$0xff]   ;;  %v3551_v6 = vld [vmem:[#allocation10 + $0x78] sm:$0xff]  }
 0x297   :  { %v3552_v7 = vld [vmem:[#allocation10 + $0xf8] sm:$0xff]  }
 0x299   :  { %2217 = vmatpush1.bf16.msra.mxu0 %v3481_v8  ;;  %2299 = vmatpush1.bf16.msra.mxu1 %v3484_v63  ;;  %v3553_v8 = vld [vmem:[#allocation10 + $0x38] sm:$0xff]  }
 0x29a   :  { %2218 = vmatprep.subr.bf16.mxu0 %v3489_v9  ;;  %2300 = vmatprep.subr.bf16.mxu1 %v3492_v11  ;;  %v3554_v63 = vld [vmem:[#allocation10 + $0xb8] sm:$0xff]  }
 0x29b   :  { %v1495_v9 = vld [vmem:[%s3901_s6] sm:$0xf] }
 0x29c   :  { %v1500_v11 = vrot.slane %v1495_v9, %v3830_v38 }
 0x29d   :  { %2219 = vmatpush1.bf16.msra.mxu0 %v3487_v12  ;;  %2301 = vmatpush1.bf16.msra.mxu1 %v3490_v13  ;;  %v1508_v12 = vrot.slane %v1495_v9, %v3852_v53  ;;  %v1504_v13 = vrot.slane %v1495_v9, %v3838_v40 }
 0x29e   :  { %2220 = vmatprep.subr.bf16.mxu0 %v3495_v14  ;;  %2302 = vmatprep.subr.bf16.mxu1 %v3498_v16  ;;  %v1512_v14 = vrot.slane %v1495_v9, %v3845_v51 }
 0x2a1   :  { %2221 = vmatpush1.bf16.msra.mxu0 %v3493_v17  ;;  %2303 = vmatpush1.bf16.msra.mxu1 %v3496_v18 }
 0x2a2   :  { %2222 = vmatprep.subr.bf16.mxu0 %v3501_v19  ;;  %2304 = vmatprep.subr.bf16.mxu1 %v3504_v20 }
 0x2a5   :  { %2223 = vmatpush1.bf16.msra.mxu0 %v3499_v21  ;;  %2305 = vmatpush1.bf16.msra.mxu1 %v3502_v22 }
 0x2a6   :  { %2224 = vmatprep.subr.bf16.mxu0 %v3507_v23  ;;  %2306 = vmatprep.subr.bf16.mxu1 %v3510_v24 }
 0x2a9   :  { %2225 = vmatpush1.bf16.msra.mxu0 %v3505_v25  ;;  %2307 = vmatpush1.bf16.msra.mxu1 %v3508_v26 }
 0x2aa   :  { %2226 = vmatprep.subr.bf16.mxu0 %v3513_v28  ;;  %2308 = vmatprep.subr.bf16.mxu1 %v3516_v29 }
 0x2ad   :  { %2227 = vmatpush1.bf16.msra.mxu0 %v3511_v30  ;;  %2309 = vmatpush1.bf16.msra.mxu1 %v3514_v31 }
 0x2ae   :  { %2228 = vmatprep.subr.bf16.mxu0 %v3519_v33  ;;  %2310 = vmatprep.subr.bf16.mxu1 %v3522_v34  ;;  %v2979_v34 = vld [vmem:[%s3903_s8] ss:$0 sm:$0xff] }
 0x2b1   :  { %2229 = vmatpush1.bf16.msra.mxu0 %v3517_v35  ;;  %2311 = vmatpush1.bf16.msra.mxu1 %v3520_v36 }
 0x2b2   :  { %3012 = vmatprep.subr.bf16.mxu0 %v3523_v10  ;;  %3034 = vmatprep.subr.bf16.mxu1 %v3524_v42 }
 0x2b4   :  { %2231 = vmatmul.mubr.bf16.vlgmr.msra.gmra.mrb[8].mxu0 %v1365_v45  ;;  %2313 = vmatmul.mubr.bf16.vlgmr.msra.gmra.mrb[8].mxu1 %v1365_v45 }
 0x2b5   :  { %3013 = vmatpush3.bf16.msra.mxu0 %v3525_v43  ;;  %3035 = vmatpush3.bf16.msra.mxu1 %v3526_v44 }
 0x2b6   :  { %3014 = vmatprep.subr.bf16.mxu0 %v3527_v15  ;;  %3036 = vmatprep.subr.bf16.mxu1 %v3528_v46 }
 0x2b9   :  { %3015 = vmatpush3.bf16.msra.mxu0 %v3529_v47  ;;  %3037 = vmatpush3.bf16.msra.mxu1 %v3530_v48 }
 0x2ba   :  { %3016 = vmatprep.subr.bf16.mxu0 %v3531_v49  ;;  %3038 = vmatprep.subr.bf16.mxu1 %v3532_v50 }
 0x2bd   :  { %3017 = vmatpush3.bf16.msra.mxu0 %v3533_v52  ;;  %3039 = vmatpush3.bf16.msra.mxu1 %v3534_v54 }
 0x2be   :  { %3018 = vmatprep.subr.bf16.mxu0 %v3535_v55  ;;  %3040 = vmatprep.subr.bf16.mxu1 %v3536_v56 }
 0x2c1   :  { %3019 = vmatpush3.bf16.msra.mxu0 %v3537_v57  ;;  %3041 = vmatpush3.bf16.msra.mxu1 %v3538_v58 }
 0x2c2   :  { %3020 = vmatprep.subr.bf16.mxu0 %v3539_v59  ;;  %3042 = vmatprep.subr.bf16.mxu1 %v3540_v60 }
 0x2c5   :  { %3021 = vmatpush3.bf16.msra.mxu0 %v3541_v61  ;;  %3043 = vmatpush3.bf16.msra.mxu1 %v3542_v62 }
 0x2c6   :  { %3022 = vmatprep.subr.bf16.mxu0 %v3543_v37  ;;  %3044 = vmatprep.subr.bf16.mxu1 %v3544_v0 }
 0x2c9   :  { %3023 = vmatpush3.bf16.msra.mxu0 %v3545_v1  ;;  %3045 = vmatpush3.bf16.msra.mxu1 %v3546_v2 }
 0x2ca   :  { %3024 = vmatprep.subr.bf16.mxu0 %v3547_v3  ;;  %3046 = vmatprep.subr.bf16.mxu1 %v3548_v4 }
 0x2cd   :  { %3025 = vmatpush3.bf16.msra.mxu0 %v3549_v39  ;;  %3047 = vmatpush3.bf16.msra.mxu1 %v3550_v5 }
 0x2ce   :  { %3026 = vmatprep.subr.bf16.mxu0 %v3551_v6  ;;  %3048 = vmatprep.subr.bf16.mxu1 %v3552_v7 }
 0x2d1   :  { %3027 = vmatpush3.bf16.msra.mxu0 %v3553_v8  ;;  %3049 = vmatpush3.bf16.msra.mxu1 %v3554_v63 }
 0x387   :  { %v2232_v16 = vpop.f32.mrb[8].mxu0  ;;  %v2314_v17 = vpop.f32.mrb[8].mxu1 }
 0x388   :  { %v3060_v18 = vadd.f32 %v2232_v16, %v1500_v11  ;;  %v3062_v19 = vadd.f32 %v2314_v17, %v1508_v12  ;;  %v2234_v20 = vpop.f32.mrb[9].mxu0  ;;  %v2316_v21 = vpop.f32.mrb[9].mxu1 }
 0x389   :  { %v3061_v22 = vadd.f32 %v2234_v20, %v1504_v13  ;;  %v3063_v23 = vadd.f32 %v2316_v21, %v1512_v14  ;;  %v2236_v24 = vpop.f32.mrb[10].mxu0  ;;  %v2318_v25 = vpop.f32.mrb[10].mxu1 }
 0x38a   :  { %v2321_v26 = vmax.f32 %v3060_v18, 0.0  ;;  %v2323_v27 = vmax.f32 %v3062_v19, 0.0  ;;  %v2237_v28 = vpop.f32.mrb[11].mxu0  ;;  %v2319_v38 = vpop.f32.mrb[11].mxu1 }
 0x38b   :  { %v2322_v29 = vmax.f32 %v3061_v22, 0.0  ;;  %v2324_v53 = vmax.f32 %v3063_v23, 0.0 }
 0x38c   :  { %v2325_v31 = vpack.c.bf16 %v2321_v26, %v2321_v26  ;;  %v2327_v51 = vpack.c.bf16 %v2323_v27, %v2323_v27 }
 0x38d   :  { %v2326_v30 = vpack.c.bf16 %v2322_v29, %v2322_v29  ;;  %v2328_v40 = vpack.c.bf16 %v2324_v53, %v2324_v53 }
 0x38f   :  { %2624 = vmatprep.mubr.bf16.mxu0 %v2326_v30  ;;  %2664 = vmatprep.mubr.bf16.mxu1 %v2328_v40 }
 0x390   :  { %2625 = vmatmul.mubr.bf16.vlgmr.msra.gmra.mrb[12].mxu0 %v2325_v31  ;;  %2665 = vmatmul.mubr.bf16.vlgmr.msra.gmra.mrb[12].mxu1 %v2327_v51 }
 0x463   :  { %v3028_v32 = vpop.f32.mrb[12].mxu0  ;;  %v3050_v33 = vpop.f32.mrb[12].mxu1 }
 0x464   :  { %v3029_v35 = vpop.f32.mrb[13].mxu0  ;;  %v3051_v36 = vpop.f32.mrb[13].mxu1 }
 0x465   :  { %v3030_v41 = vadd.f32 %v3029_v35, %v3028_v32  ;;  %v3052_v10 = vadd.f32 %v3051_v36, %v3050_v33  ;;  %v3031_v42 = vpop.f32.mrb[14].mxu0  ;;  %v3053_v43 = vpop.f32.mrb[14].mxu1 }
 0x466   :  { %v3032_v44 = vpop.f32.mrb[15].mxu0  ;;  %v3054_v45 = vpop.f32.mrb[15].mxu1 }
 0x467   :  { %v2627_v15 = vadd.f32 %v3030_v41, %v2979_v34 }
 0x469   :  { %v2667_v46 = vadd.f32 %v3052_v10, %v2627_v15 }
 0x46b   :  { %3555 = vtanh.f32 %v2667_v46 }
 0x475   :  { %v3556_v47 = vpop.eup %3555 }
 0x476   :  { %2673 = vst [vmem:[#allocation11] sm:$0xff] %v3556_v47 }
 0x477   :  { %3678 = shalt.err (!%p3675_p2)
}
 0x478   :  { %s3679_s14 = scalar_lea.hbm %s3904_s9, 128 }
 0x479   :  { %p3680_p3 = scmp.ne.s32.totalorder %s3904_s9, %s3679_s14  ;;  %p3683_p4 = scmp.lt.u32.totalorder %s3679_s14, %s3904_s9 }
 0x47b   :  { %p3685_p5 = pnand %p3683_p4, %p3680_p3 }
 0x47d   :  { %3688 = shalt.err (!%p3685_p5)
}
 0x47e   :  { %2683 = dma.vmem_to_hbm [thread:$0]  %s2681_s13, 128, %s3904_s9, [#allocation4]  }
 0x47f   :  { %3695 = dma.done.wait [#allocation4], 128  }
 0x480   :  { %3696 = vsyncadd [#allocation4], 4294967168 }
 0x481   :  { %2687 = vsyncpa [#allocation3], 1 }
 0x482   :  { %2688 = vsyncpa [#allocation6], 1 }
 0x483   :  { %2689 = vsyncpa [#allocation9], 1 }
 0x484   :  { %2690 = vsyncpa [#allocation4], 1 }

</bundles_post_ra>
